<compile_context>
chip_gen: v7x
topology: tpu7x:2x2x1
jax: 0.10.0
libtpu: 0.0.40
codegen_flags: <defaults>
</compile_context>

<pallas_src>
import functools

import jax
import jax.numpy as jnp
from jax.experimental import pallas as pl
from jax.experimental.pallas import tpu as pltpu

LANE = 128


def _round_up(x, m):
    return (x + m - 1) // m * m


def _pad_last(a, target, value=0.0):
    pad = target - a.shape[-1]
    if pad == 0:
        return a
    widths = [(0, 0)] * (a.ndim - 1) + [(0, pad)]
    return jnp.pad(a, widths, constant_values=value)


def _pad_2d(a, rows, cols):
    pr, pc = rows - a.shape[0], cols - a.shape[1]
    if pr == 0 and pc == 0:
        return a
    return jnp.pad(a, ((0, pr), (0, pc)))


def _mosaic_params(block_bytes):
    # Double-buffered blocks + headroom, clamped to [32 MiB, 64 MiB]
    # (64 MiB == v7x physical VMEM, the smallest across v5e/v6e/v7x).
    limit = int(min(max(2 * block_bytes + (16 << 20), 32 << 20), 64 << 20))
    return pltpu.CompilerParams(
        dimension_semantics=("parallel",), vmem_limit_bytes=limit)


# ----------------------------------------------------------------------------
# Kernel 1: fused depthwise 3x3 (stride=2, pad=1) + pointwise 1x1, one image.
#   pee/peo/poe/poo : (Ho+1, Wo+1, C)  (H-parity, W-parity) phases of the
#                     spatially padded input (built once in the wrapper), so
#                     every tap below is a contiguous read — no scratch, no
#                     zero-fill, no strided loads.
#   dw_ref : (9, C) f32     per-channel depthwise taps
#   pw_ref : (C, Co) bf16   pointwise weights (MXU operand)
#   y_ref  : (Ho, Wo, Co) bf16   pre-BatchNorm output
#   stats  : (2, Co) f32    per-image [sum(y), sum(y*y)]
# ----------------------------------------------------------------------------
def _dw_s2_pw_kernel(pee_ref, peo_ref, poe_ref, poo_ref, dw_ref, pw_ref,
                     y_ref, stats_ref, *, Ho, Wo):
    C = pee_ref.shape[-1]
    Co = pw_ref.shape[1]
    w = dw_ref[...]  # (9, C), hoisted out of the tap chain

    # Output pixel (i,j) = sum_{kh,kw} x_pad[2i+kh, 2j+kw] * w[kh,kw]; in phase
    # coordinates all nine taps are contiguous (Ho, Wo, C) windows.
    acc = pee_ref[pl.ds(0, Ho), pl.ds(0, Wo), :] * w[0]    # (kh=0, kw=0)
    acc += peo_ref[pl.ds(0, Ho), pl.ds(0, Wo), :] * w[1]   # (0, 1)
    acc += pee_ref[pl.ds(0, Ho), pl.ds(1, Wo), :] * w[2]   # (0, 2)
    acc += poe_ref[pl.ds(0, Ho), pl.ds(0, Wo), :] * w[3]   # (1, 0)
    acc += poo_ref[pl.ds(0, Ho), pl.ds(0, Wo), :] * w[4]   # (1, 1)
    acc += poe_ref[pl.ds(0, Ho), pl.ds(1, Wo), :] * w[5]   # (1, 2)
    acc += pee_ref[pl.ds(1, Ho), pl.ds(0, Wo), :] * w[6]   # (2, 0)
    acc += peo_ref[pl.ds(1, Ho), pl.ds(0, Wo), :] * w[7]   # (2, 1)
    acc += pee_ref[pl.ds(1, Ho), pl.ds(1, Wo), :] * w[8]   # (2, 2)

    # 1x1 conv == MXU matmul: bf16 operands, f32 accumulation.
    y2d = jnp.dot(acc.reshape(Ho * Wo, C).astype(jnp.bfloat16), pw_ref[...],
                  preferred_element_type=jnp.float32)
    y_ref[...] = y2d.reshape(Ho, Wo, Co).astype(y_ref.dtype)

    # Partial sums (f32, pre-downcast) for exact training-mode BatchNorm stats.
    stats_ref[pl.ds(0, 1), :] = jnp.sum(y2d, axis=0, keepdims=True)
    stats_ref[pl.ds(1, 1), :] = jnp.sum(y2d * y2d, axis=0, keepdims=True)


# ----------------------------------------------------------------------------
# Kernel 2: fused BN1(scale/shift)+ReLU -> depthwise 3x3 (stride=1, pad=1)
#           -> pointwise 1x1, one image.  Same output structure as kernel 1.
# ----------------------------------------------------------------------------
def _bnrelu_dw_s1_pw_kernel(x_ref, dw_ref, pw_ref, sc_ref, sh_ref,
                            y_ref, stats_ref, xp_s, *, ksize):
    H, W, C = x_ref.shape
    Co = pw_ref.shape[1]

    # Border-only zeroing of the halo scratch (interior is fully overwritten
    # below).  Done every step — megacore-safe, and only 4 thin slabs of stores
    # instead of a full-tile zero pass.
    zrow = jnp.zeros((1, W + 2, C), jnp.float32)
    zcol = jnp.zeros((H + 2, 1, C), jnp.float32)
    xp_s[pl.ds(0, 1), :, :] = zrow
    xp_s[pl.ds(H + 1, 1), :, :] = zrow
    xp_s[:, pl.ds(0, 1), :] = zcol
    xp_s[:, pl.ds(W + 1, 1), :] = zcol

    # Previous stage's BatchNorm + ReLU fused on the fly (scale/shift are the
    # precombined gamma*rsqrt(var+eps) and beta - mean*scale vectors).
    xin = jnp.maximum(
        x_ref[...].astype(jnp.float32) * sc_ref[...] + sh_ref[...], 0.0)
    xp_s[pl.ds(1, H), pl.ds(1, W), :] = xin

    w = dw_ref[...]
    acc = xp_s[pl.ds(0, H), pl.ds(0, W), :] * w[0]
    for kh in range(ksize):
        for kw in range(ksize):
            if kh == 0 and kw == 0:
                continue
            acc += xp_s[pl.ds(kh, H), pl.ds(kw, W), :] * w[kh * ksize + kw]

    y2d = jnp.dot(acc.reshape(H * W, C).astype(jnp.bfloat16), pw_ref[...],
                  preferred_element_type=jnp.float32)
    y_ref[...] = y2d.reshape(H, W, Co).astype(y_ref.dtype)
    stats_ref[pl.ds(0, 1), :] = jnp.sum(y2d, axis=0, keepdims=True)
    stats_ref[pl.ds(1, 1), :] = jnp.sum(y2d * y2d, axis=0, keepdims=True)


# ----------------------------------------------------------------------------
# pallas_call wrappers
# ----------------------------------------------------------------------------
def _stage1(pee, peo, poe, poo, dw, pw):
    N, Hp, Wp, C = pee.shape          # Hp = Ho+1, Wp = Wo+1
    Ho, Wo = Hp - 1, Wp - 1
    Co = pw.shape[1]
    kk = dw.shape[0]
    kernel = functools.partial(_dw_s2_pw_kernel, Ho=Ho, Wo=Wo)
    block_bytes = (4 * Hp * Wp * C * 4 + kk * C * 4 + C * Co * 2
                   + Ho * Wo * Co * 2 + 2 * Co * 4)
    phase_spec = pl.BlockSpec((None, Hp, Wp, C), lambda n: (n, 0, 0, 0))
    return pl.pallas_call(
        kernel,
        grid=(N,),
        in_specs=[
            phase_spec, phase_spec, phase_spec, phase_spec,
            pl.BlockSpec((kk, C), lambda n: (0, 0)),
            pl.BlockSpec((C, Co), lambda n: (0, 0)),
        ],
        out_specs=(
            pl.BlockSpec((None, Ho, Wo, Co), lambda n: (n, 0, 0, 0)),
            pl.BlockSpec((None, 2, Co), lambda n: (n, 0, 0)),
        ),
        out_shape=(
            jax.ShapeDtypeStruct((N, Ho, Wo, Co), jnp.bfloat16),
            jax.ShapeDtypeStruct((N, 2, Co), jnp.float32),
        ),
        compiler_params=_mosaic_params(block_bytes),
    )(pee, peo, poe, poo, dw, pw)


def _stage2(y1, dw, pw, scale, shift, *, ksize):
    N, H, W, C = y1.shape
    Co = pw.shape[1]
    kernel = functools.partial(_bnrelu_dw_s1_pw_kernel, ksize=ksize)
    block_bytes = (H * W * C * 2 + ksize * ksize * C * 4 + C * Co * 2
                   + 2 * C * 4 + (H + 2) * (W + 2) * C * 4
                   + H * W * Co * 2 + 2 * Co * 4)
    return pl.pallas_call(
        kernel,
        grid=(N,),
        in_specs=[
            pl.BlockSpec((None, H, W, C), lambda n: (n, 0, 0, 0)),
            pl.BlockSpec((ksize * ksize, C), lambda n: (0, 0)),
            pl.BlockSpec((C, Co), lambda n: (0, 0)),
            pl.BlockSpec((1, C), lambda n: (0, 0)),
            pl.BlockSpec((1, C), lambda n: (0, 0)),
        ],
        out_specs=(
            pl.BlockSpec((None, H, W, Co), lambda n: (n, 0, 0, 0)),
            pl.BlockSpec((None, 2, Co), lambda n: (n, 0, 0)),
        ),
        out_shape=(
            jax.ShapeDtypeStruct((N, H, W, Co), jnp.bfloat16),
            jax.ShapeDtypeStruct((N, 2, Co), jnp.float32),
        ),
        scratch_shapes=[pltpu.VMEM((H + 2, W + 2, C), jnp.float32)],
        compiler_params=_mosaic_params(block_bytes),
    )(y1, dw, pw, scale, shift)


def _bn_scale_shift(stats, gamma, beta, m, eps):
    # Exact training-mode BatchNorm from the per-image partial sums.
    s = jnp.sum(stats, axis=0)                           # (2, C)
    mean = s[0] / m
    var = jnp.maximum(s[1] / m - mean * mean, 0.0)       # biased variance
    scale = gamma[0] * jax.lax.rsqrt(var + eps)
    shift = beta[0] - mean * scale
    return scale[None, :], shift[None, :]


# ----------------------------------------------------------------------------
# SepConv module: parameters + forward
# ----------------------------------------------------------------------------
def init_sepconv_params(key, channel_in, channel_out, ksize=3):
    k0, k1, k2, k3 = jax.random.split(key, 4)
    scale = 0.1
    return {
        # depthwise weights: PyTorch (C, 1, K, K) stored here as (K*K, C)
        "dw1": scale * jax.random.normal(k0, (ksize * ksize, channel_in), jnp.float32),
        # pointwise weights: PyTorch (Cout, Cin, 1, 1) stored as (Cin, Cout)
        "pw1": scale * jax.random.normal(k1, (channel_in, channel_in), jnp.float32),
        "bn1_gamma": jnp.ones((1, channel_in), jnp.float32),
        "bn1_beta": jnp.zeros((1, channel_in), jnp.float32),
        "dw2": scale * jax.random.normal(k2, (ksize * ksize, channel_in), jnp.float32),
        "pw2": scale * jax.random.normal(k3, (channel_in, channel_out), jnp.float32),
        "bn2_gamma": jnp.ones((1, channel_out), jnp.float32),
        "bn2_beta": jnp.zeros((1, channel_out), jnp.float32),
    }


def sepconv_forward(x_nchw, params, *, ksize=3, eps=1e-5):
    N, Cin, H, W = x_nchw.shape
    assert ksize == 3 and H % 2 == 0 and W % 2 == 0, (
        "this implementation assumes kernel_size=3, pad=1, even spatial dims")
    Cout = params["pw2"].shape[1]
    Cpi = _round_up(Cin, LANE)
    Cpo = _round_up(Cout, LANE)

    # NCHW -> NHWC, lane-pad channels, spatial pad=1, and split the padded image
    # into its four (H-parity, W-parity) phases in one XLA pass so every
    # stride-2 depthwise tap in kernel 1 is a contiguous read (no in-kernel
    # halo scratch, zero-fill or strided sublane loads).
    x = _pad_last(jnp.transpose(x_nchw, (0, 2, 3, 1)).astype(jnp.float32), Cpi)
    xp = jnp.pad(x, ((0, 0), (1, 1), (1, 1), (0, 0)))
    pee = xp[:, 0::2, 0::2, :]
    peo = xp[:, 0::2, 1::2, :]
    poe = xp[:, 1::2, 0::2, :]
    poo = xp[:, 1::2, 1::2, :]

    dw1 = _pad_last(params["dw1"].astype(jnp.float32), Cpi)
    pw1 = _pad_2d(params["pw1"], Cpi, Cpi).astype(jnp.bfloat16)   # MXU operand
    dw2 = _pad_last(params["dw2"].astype(jnp.float32), Cpi)
    pw2 = _pad_2d(params["pw2"], Cpi, Cpo).astype(jnp.bfloat16)   # MXU operand
    g1 = _pad_last(params["bn1_gamma"].astype(jnp.float32), Cpi, value=1.0)
    b1 = _pad_last(params["bn1_beta"].astype(jnp.float32), Cpi)
    g2 = _pad_last(params["bn2_gamma"].astype(jnp.float32), Cpo, value=1.0)
    b2 = _pad_last(params["bn2_beta"].astype(jnp.float32), Cpo)

    # Stage 1: dw(stride=2) + 1x1 fused; emits pre-BN y1 (bf16) + SumY/SumY2.
    y1, stats1 = _stage1(pee, peo, poe, poo, dw1, pw1)
    _, Ho, Wo, _ = y1.shape
    scale1, shift1 = _bn_scale_shift(stats1, g1, b1, N * Ho * Wo, eps)

    # Stage 2: BN1+ReLU fused into dw(stride=1) + 1x1; emits pre-BN y2 + partials.
    y2, stats2 = _stage2(y1, dw2, pw2, scale1, shift1, ksize=ksize)
    scale2, shift2 = _bn_scale_shift(stats2, g2, b2, N * Ho * Wo, eps)

    # Final BN2 + ReLU + channel un-pad + NHWC->NCHW as a single XLA fusion
    # (no extra Pallas pass / padded f32 HBM round-trip).
    y2r = y2[..., :Cout].astype(jnp.float32)
    out = jnp.maximum(y2r * scale2[0, :Cout] + shift2[0, :Cout], 0.0)
    return jnp.transpose(out, (0, 3, 1, 2))


# TODO(synk): BatchNorm running_mean/running_var buffer updates (a training-time
# side effect that does not change this forward's output) are not tracked.

if __name__ == "__main__":
    key = jax.random.PRNGKey(0)
    k_x, k_p = jax.random.split(key)

    batch, channel_in, channel_out, spatial = 2, 8, 16, 16
    x = jax.random.normal(k_x, (batch, channel_in, spatial, spatial), jnp.float32)
    params = init_sepconv_params(k_p, channel_in, channel_out)

    out = jax.jit(sepconv_forward)(x, params)
    out = jax.block_until_ready(out)

    expected = (batch, channel_out, spatial // 2, spatial // 2)
    assert out.shape == expected, (out.shape, expected)
    assert bool(jnp.all(jnp.isfinite(out)))
    assert bool(jnp.all(out >= 0.0))  # final ReLU

    print("KERNEL_OK")
</pallas_src>

<mosaic_0001>
module attributes {stable_mosaic.version = 11 : i64} {
  func.func @_dw_s2_pw_kernel(%arg0: i32, %arg1: memref<1x9x9x128xf32, #tpu.memory_space<vmem>>, %arg2: memref<1x9x9x128xf32, #tpu.memory_space<vmem>>, %arg3: memref<1x9x9x128xf32, #tpu.memory_space<vmem>>, %arg4: memref<1x9x9x128xf32, #tpu.memory_space<vmem>>, %arg5: memref<9x128xf32, #tpu.memory_space<vmem>>, %arg6: memref<128x128xbf16, #tpu.memory_space<vmem>>, %arg7: memref<1x8x8x128xbf16, #tpu.memory_space<vmem>>, %arg8: memref<1x2x128xf32, #tpu.memory_space<vmem>>) attributes {dimension_semantics = [#tpu.dimension_semantics<parallel>], iteration_bounds = array<i64: 2>, scalar_prefetch = 0 : i64, scratch_operands = 0 : i64, tpu.core_type = #tpu.core_type<tc>, window_params = [{transform_indices = @transform_0, window_bounds = array<i64: 1, 9, 9, 128>}, {transform_indices = @transform_1, window_bounds = array<i64: 1, 9, 9, 128>}, {transform_indices = @transform_2, window_bounds = array<i64: 1, 9, 9, 128>}, {transform_indices = @transform_3, window_bounds = array<i64: 1, 9, 9, 128>}, {pipeline_mode = #tpu.pipeline_mode<synchronous>, transform_indices = @transform_4, window_bounds = array<i64: 9, 128>}, {pipeline_mode = #tpu.pipeline_mode<synchronous>, transform_indices = @transform_5, window_bounds = array<i64: 128, 128>}, {transform_indices = @transform_6, window_bounds = array<i64: 1, 8, 8, 128>}, {transform_indices = @transform_7, window_bounds = array<i64: 1, 2, 128>}]} {
    %c0 = arith.constant 0 : index
    %c0_0 = arith.constant 0 : index
    %0 = vector.load %arg5[%c0, %c0_0] : memref<9x128xf32, #tpu.memory_space<vmem>>, vector<9x128xf32>
    %c0_1 = arith.constant 0 : index
    %c0_2 = arith.constant 0 : index
    %c0_3 = arith.constant 0 : index
    %c0_4 = arith.constant 0 : index
    %1 = vector.load %arg1[%c0_1, %c0_2, %c0_3, %c0_4] : memref<1x9x9x128xf32, #tpu.memory_space<vmem>>, vector<1x8x8x128xf32>
    %2 = vector.shape_cast %1 : vector<1x8x8x128xf32> to vector<8x8x128xf32>
    %3 = vector.extract_strided_slice %0 {offsets = [0, 0], sizes = [1, 128], strides = [1, 1]} : vector<9x128xf32> to vector<1x128xf32>
    %4 = vector.shape_cast %3 : vector<1x128xf32> to vector<128xf32>
    %5 = vector.shape_cast %4 : vector<128xf32> to vector<1x1x128xf32>
    %6 = vector.broadcast %5 : vector<1x1x128xf32> to vector<8x8x128xf32>
    %7 = arith.mulf %2, %6 : vector<8x8x128xf32>
    %c0_5 = arith.constant 0 : index
    %c0_6 = arith.constant 0 : index
    %c0_7 = arith.constant 0 : index
    %c0_8 = arith.constant 0 : index
    %8 = vector.load %arg2[%c0_5, %c0_6, %c0_7, %c0_8] : memref<1x9x9x128xf32, #tpu.memory_space<vmem>>, vector<1x8x8x128xf32>
    %9 = vector.shape_cast %8 : vector<1x8x8x128xf32> to vector<8x8x128xf32>
    %10 = vector.extract_strided_slice %0 {offsets = [1, 0], sizes = [1, 128], strides = [1, 1]} : vector<9x128xf32> to vector<1x128xf32>
    %11 = vector.shape_cast %10 : vector<1x128xf32> to vector<128xf32>
    %12 = vector.shape_cast %11 : vector<128xf32> to vector<1x1x128xf32>
    %13 = vector.broadcast %12 : vector<1x1x128xf32> to vector<8x8x128xf32>
    %14 = arith.mulf %9, %13 : vector<8x8x128xf32>
    %15 = arith.addf %7, %14 : vector<8x8x128xf32>
    %c0_9 = arith.constant 0 : index
    %c0_10 = arith.constant 0 : index
    %c1 = arith.constant 1 : index
    %c0_11 = arith.constant 0 : index
    %16 = vector.load %arg1[%c0_9, %c0_10, %c1, %c0_11] : memref<1x9x9x128xf32, #tpu.memory_space<vmem>>, vector<1x8x8x128xf32>
    %17 = vector.shape_cast %16 : vector<1x8x8x128xf32> to vector<8x8x128xf32>
    %18 = vector.extract_strided_slice %0 {offsets = [2, 0], sizes = [1, 128], strides = [1, 1]} : vector<9x128xf32> to vector<1x128xf32>
    %19 = vector.shape_cast %18 : vector<1x128xf32> to vector<128xf32>
    %20 = vector.shape_cast %19 : vector<128xf32> to vector<1x1x128xf32>
    %21 = vector.broadcast %20 : vector<1x1x128xf32> to vector<8x8x128xf32>
    %22 = arith.mulf %17, %21 : vector<8x8x128xf32>
    %23 = arith.addf %15, %22 : vector<8x8x128xf32>
    %c0_12 = arith.constant 0 : index
    %c0_13 = arith.constant 0 : index
    %c0_14 = arith.constant 0 : index
    %c0_15 = arith.constant 0 : index
    %24 = vector.load %arg3[%c0_12, %c0_13, %c0_14, %c0_15] : memref<1x9x9x128xf32, #tpu.memory_space<vmem>>, vector<1x8x8x128xf32>
    %25 = vector.shape_cast %24 : vector<1x8x8x128xf32> to vector<8x8x128xf32>
    %26 = vector.extract_strided_slice %0 {offsets = [3, 0], sizes = [1, 128], strides = [1, 1]} : vector<9x128xf32> to vector<1x128xf32>
    %27 = vector.shape_cast %26 : vector<1x128xf32> to vector<128xf32>
    %28 = vector.shape_cast %27 : vector<128xf32> to vector<1x1x128xf32>
    %29 = vector.broadcast %28 : vector<1x1x128xf32> to vector<8x8x128xf32>
    %30 = arith.mulf %25, %29 : vector<8x8x128xf32>
    %31 = arith.addf %23, %30 : vector<8x8x128xf32>
    %c0_16 = arith.constant 0 : index
    %c0_17 = arith.constant 0 : index
    %c0_18 = arith.constant 0 : index
    %c0_19 = arith.constant 0 : index
    %32 = vector.load %arg4[%c0_16, %c0_17, %c0_18, %c0_19] : memref<1x9x9x128xf32, #tpu.memory_space<vmem>>, vector<1x8x8x128xf32>
    %33 = vector.shape_cast %32 : vector<1x8x8x128xf32> to vector<8x8x128xf32>
    %34 = vector.extract_strided_slice %0 {offsets = [4, 0], sizes = [1, 128], strides = [1, 1]} : vector<9x128xf32> to vector<1x128xf32>
    %35 = vector.shape_cast %34 : vector<1x128xf32> to vector<128xf32>
    %36 = vector.shape_cast %35 : vector<128xf32> to vector<1x1x128xf32>
    %37 = vector.broadcast %36 : vector<1x1x128xf32> to vector<8x8x128xf32>
    %38 = arith.mulf %33, %37 : vector<8x8x128xf32>
    %39 = arith.addf %31, %38 : vector<8x8x128xf32>
    %c0_20 = arith.constant 0 : index
    %c0_21 = arith.constant 0 : index
    %c1_22 = arith.constant 1 : index
    %c0_23 = arith.constant 0 : index
    %40 = vector.load %arg3[%c0_20, %c0_21, %c1_22, %c0_23] : memref<1x9x9x128xf32, #tpu.memory_space<vmem>>, vector<1x8x8x128xf32>
    %41 = vector.shape_cast %40 : vector<1x8x8x128xf32> to vector<8x8x128xf32>
    %42 = vector.extract_strided_slice %0 {offsets = [5, 0], sizes = [1, 128], strides = [1, 1]} : vector<9x128xf32> to vector<1x128xf32>
    %43 = vector.shape_cast %42 : vector<1x128xf32> to vector<128xf32>
    %44 = vector.shape_cast %43 : vector<128xf32> to vector<1x1x128xf32>
    %45 = vector.broadcast %44 : vector<1x1x128xf32> to vector<8x8x128xf32>
    %46 = arith.mulf %41, %45 : vector<8x8x128xf32>
    %47 = arith.addf %39, %46 : vector<8x8x128xf32>
    %c0_24 = arith.constant 0 : index
    %c1_25 = arith.constant 1 : index
    %c0_26 = arith.constant 0 : index
    %c0_27 = arith.constant 0 : index
    %48 = vector.load %arg1[%c0_24, %c1_25, %c0_26, %c0_27] : memref<1x9x9x128xf32, #tpu.memory_space<vmem>>, vector<1x8x8x128xf32>
    %49 = vector.shape_cast %48 : vector<1x8x8x128xf32> to vector<8x8x128xf32>
    %50 = vector.extract_strided_slice %0 {offsets = [6, 0], sizes = [1, 128], strides = [1, 1]} : vector<9x128xf32> to vector<1x128xf32>
    %51 = vector.shape_cast %50 : vector<1x128xf32> to vector<128xf32>
    %52 = vector.shape_cast %51 : vector<128xf32> to vector<1x1x128xf32>
    %53 = vector.broadcast %52 : vector<1x1x128xf32> to vector<8x8x128xf32>
    %54 = arith.mulf %49, %53 : vector<8x8x128xf32>
    %55 = arith.addf %47, %54 : vector<8x8x128xf32>
    %c0_28 = arith.constant 0 : index
    %c1_29 = arith.constant 1 : index
    %c0_30 = arith.constant 0 : index
    %c0_31 = arith.constant 0 : index
    %56 = vector.load %arg2[%c0_28, %c1_29, %c0_30, %c0_31] : memref<1x9x9x128xf32, #tpu.memory_space<vmem>>, vector<1x8x8x128xf32>
    %57 = vector.shape_cast %56 : vector<1x8x8x128xf32> to vector<8x8x128xf32>
    %58 = vector.extract_strided_slice %0 {offsets = [7, 0], sizes = [1, 128], strides = [1, 1]} : vector<9x128xf32> to vector<1x128xf32>
    %59 = vector.shape_cast %58 : vector<1x128xf32> to vector<128xf32>
    %60 = vector.shape_cast %59 : vector<128xf32> to vector<1x1x128xf32>
    %61 = vector.broadcast %60 : vector<1x1x128xf32> to vector<8x8x128xf32>
    %62 = arith.mulf %57, %61 : vector<8x8x128xf32>
    %63 = arith.addf %55, %62 : vector<8x8x128xf32>
    %c0_32 = arith.constant 0 : index
    %c1_33 = arith.constant 1 : index
    %c1_34 = arith.constant 1 : index
    %c0_35 = arith.constant 0 : index
    %64 = vector.load %arg1[%c0_32, %c1_33, %c1_34, %c0_35] : memref<1x9x9x128xf32, #tpu.memory_space<vmem>>, vector<1x8x8x128xf32>
    %65 = vector.shape_cast %64 : vector<1x8x8x128xf32> to vector<8x8x128xf32>
    %66 = vector.extract_strided_slice %0 {offsets = [8, 0], sizes = [1, 128], strides = [1, 1]} : vector<9x128xf32> to vector<1x128xf32>
    %67 = vector.shape_cast %66 : vector<1x128xf32> to vector<128xf32>
    %68 = vector.shape_cast %67 : vector<128xf32> to vector<1x1x128xf32>
    %69 = vector.broadcast %68 : vector<1x1x128xf32> to vector<8x8x128xf32>
    %70 = arith.mulf %65, %69 : vector<8x8x128xf32>
    %71 = arith.addf %63, %70 : vector<8x8x128xf32>
    %72 = vector.shape_cast %71 : vector<8x8x128xf32> to vector<64x128xf32>
    %73 = arith.truncf %72 : vector<64x128xf32> to vector<64x128xbf16>
    %c0_36 = arith.constant 0 : index
    %c0_37 = arith.constant 0 : index
    %74 = vector.load %arg6[%c0_36, %c0_37] : memref<128x128xbf16, #tpu.memory_space<vmem>>, vector<128x128xbf16>
    %cst = arith.constant dense<0.000000e+00> : vector<64x128xf32>
    %75 = tpu.matmul %73, %74, %cst {dimension_numbers = #tpu.dot_dimension_numbers<[1], [0], [0], [1], [0, 0, 1, 1], [], []>} : vector<64x128xbf16>, vector<128x128xbf16>, vector<64x128xf32> -> vector<64x128xf32>
    %76 = vector.shape_cast %75 : vector<64x128xf32> to vector<8x8x128xf32>
    %77 = arith.truncf %76 : vector<8x8x128xf32> to vector<8x8x128xbf16>
    %c0_38 = arith.constant 0 : index
    %c0_39 = arith.constant 0 : index
    %c0_40 = arith.constant 0 : index
    %c0_41 = arith.constant 0 : index
    %78 = vector.load %arg7[%c0_38, %c0_39, %c0_40, %c0_41] : memref<1x8x8x128xbf16, #tpu.memory_space<vmem>>, vector<1x8x8x128xbf16>
    %79 = vector.shape_cast %78 : vector<1x8x8x128xbf16> to vector<8x8x128xbf16>
    %80 = vector.shape_cast %77 : vector<8x8x128xbf16> to vector<1x8x8x128xbf16>
    tpu.vector_store %arg7[%c0_38, %c0_39, %c0_40, %c0_41], %80 {strides = array<i32>} : memref<1x8x8x128xbf16, #tpu.memory_space<vmem>>, vector<1x8x8x128xbf16>,
    %cst_42 = arith.constant dense<0.000000e+00> : vector<128xf32>
    %81 = vector.multi_reduction <add>, %75, %cst_42 [0] : vector<64x128xf32> to vector<128xf32>
    %82 = vector.shape_cast %81 : vector<128xf32> to vector<1x128xf32>
    %c0_43 = arith.constant 0 : index
    %c0_44 = arith.constant 0 : index
    %c0_45 = arith.constant 0 : index
    %83 = vector.load %arg8[%c0_43, %c0_44, %c0_45] : memref<1x2x128xf32, #tpu.memory_space<vmem>>, vector<1x1x128xf32>
    %84 = vector.shape_cast %83 : vector<1x1x128xf32> to vector<1x128xf32>
    %85 = vector.shape_cast %82 : vector<1x128xf32> to vector<1x1x128xf32>
    tpu.vector_store %arg8[%c0_43, %c0_44, %c0_45], %85 {strides = array<i32>} : memref<1x2x128xf32, #tpu.memory_space<vmem>>, vector<1x1x128xf32>,
    %86 = arith.mulf %75, %75 : vector<64x128xf32>
    %cst_46 = arith.constant dense<0.000000e+00> : vector<128xf32>
    %87 = vector.multi_reduction <add>, %86, %cst_46 [0] : vector<64x128xf32> to vector<128xf32>
    %88 = vector.shape_cast %87 : vector<128xf32> to vector<1x128xf32>
    %c0_47 = arith.constant 0 : index
    %c1_48 = arith.constant 1 : index
    %c0_49 = arith.constant 0 : index
    %89 = vector.load %arg8[%c0_47, %c1_48, %c0_49] : memref<1x2x128xf32, #tpu.memory_space<vmem>>, vector<1x1x128xf32>
    %90 = vector.shape_cast %89 : vector<1x1x128xf32> to vector<1x128xf32>
    %91 = vector.shape_cast %88 : vector<1x128xf32> to vector<1x1x128xf32>
    tpu.vector_store %arg8[%c0_47, %c1_48, %c0_49], %91 {strides = array<i32>} : memref<1x2x128xf32, #tpu.memory_space<vmem>>, vector<1x1x128xf32>,
    return
  }
  func.func @transform_0(%arg0: i32) -> (i32, i32, i32, i32) {
    %c0_i32 = arith.constant 0 : i32
    %c0_i32_0 = arith.constant 0 : i32
    %c0_i32_1 = arith.constant 0 : i32
    %c0_i32_2 = arith.constant 0 : i32
    return %arg0, %c0_i32, %c0_i32_0, %c0_i32_1 : i32, i32, i32, i32
  }
  func.func @transform_1(%arg0: i32) -> (i32, i32, i32, i32) {
    %c0_i32 = arith.constant 0 : i32
    %c0_i32_0 = arith.constant 0 : i32
    %c0_i32_1 = arith.constant 0 : i32
    %c0_i32_2 = arith.constant 0 : i32
    return %arg0, %c0_i32, %c0_i32_0, %c0_i32_1 : i32, i32, i32, i32
  }
  func.func @transform_2(%arg0: i32) -> (i32, i32, i32, i32) {
    %c0_i32 = arith.constant 0 : i32
    %c0_i32_0 = arith.constant 0 : i32
    %c0_i32_1 = arith.constant 0 : i32
    %c0_i32_2 = arith.constant 0 : i32
    return %arg0, %c0_i32, %c0_i32_0, %c0_i32_1 : i32, i32, i32, i32
  }
  func.func @transform_3(%arg0: i32) -> (i32, i32, i32, i32) {
    %c0_i32 = arith.constant 0 : i32
    %c0_i32_0 = arith.constant 0 : i32
    %c0_i32_1 = arith.constant 0 : i32
    %c0_i32_2 = arith.constant 0 : i32
    return %arg0, %c0_i32, %c0_i32_0, %c0_i32_1 : i32, i32, i32, i32
  }
  func.func @transform_4(%arg0: i32) -> (i32, i32) {
    %c0_i32 = arith.constant 0 : i32
    %c0_i32_0 = arith.constant 0 : i32
    %c0_i32_1 = arith.constant 0 : i32
    return %c0_i32, %c0_i32_0 : i32, i32
  }
  func.func @transform_5(%arg0: i32) -> (i32, i32) {
    %c0_i32 = arith.constant 0 : i32
    %c0_i32_0 = arith.constant 0 : i32
    %c0_i32_1 = arith.constant 0 : i32
    return %c0_i32, %c0_i32_0 : i32, i32
  }
  func.func @transform_6(%arg0: i32) -> (i32, i32, i32, i32) {
    %c0_i32 = arith.constant 0 : i32
    %c0_i32_0 = arith.constant 0 : i32
    %c0_i32_1 = arith.constant 0 : i32
    %c0_i32_2 = arith.constant 0 : i32
    return %arg0, %c0_i32, %c0_i32_0, %c0_i32_1 : i32, i32, i32, i32
  }
  func.func @transform_7(%arg0: i32) -> (i32, i32, i32) {
    %c0_i32 = arith.constant 0 : i32
    %c0_i32_0 = arith.constant 0 : i32
    %c0_i32_1 = arith.constant 0 : i32
    return %arg0, %c0_i32, %c0_i32_0 : i32, i32, i32
  }
}

module attributes {stable_mosaic.version = 11 : i64} {
  func.func @_bnrelu_dw_s1_pw_kernel(%arg0: i32, %arg1: memref<1x8x8x128xbf16, #tpu.memory_space<vmem>>, %arg2: memref<9x128xf32, #tpu.memory_space<vmem>>, %arg3: memref<128x128xbf16, #tpu.memory_space<vmem>>, %arg4: memref<1x128xf32, #tpu.memory_space<vmem>>, %arg5: memref<1x128xf32, #tpu.memory_space<vmem>>, %arg6: memref<1x8x8x128xbf16, #tpu.memory_space<vmem>>, %arg7: memref<1x2x128xf32, #tpu.memory_space<vmem>>, %arg8: memref<10x10x128xf32, #tpu.memory_space<vmem>>) attributes {dimension_semantics = [#tpu.dimension_semantics<parallel>], iteration_bounds = array<i64: 2>, scalar_prefetch = 0 : i64, scratch_operands = 1 : i64, tpu.core_type = #tpu.core_type<tc>, window_params = [{transform_indices = @transform_0, window_bounds = array<i64: 1, 8, 8, 128>}, {pipeline_mode = #tpu.pipeline_mode<synchronous>, transform_indices = @transform_1, window_bounds = array<i64: 9, 128>}, {pipeline_mode = #tpu.pipeline_mode<synchronous>, transform_indices = @transform_2, window_bounds = array<i64: 128, 128>}, {pipeline_mode = #tpu.pipeline_mode<synchronous>, transform_indices = @transform_3, window_bounds = array<i64: 1, 128>}, {pipeline_mode = #tpu.pipeline_mode<synchronous>, transform_indices = @transform_4, window_bounds = array<i64: 1, 128>}, {transform_indices = @transform_5, window_bounds = array<i64: 1, 8, 8, 128>}, {transform_indices = @transform_6, window_bounds = array<i64: 1, 2, 128>}]} {
    %cst = arith.constant 0.000000e+00 : f32
    %0 = vector.broadcast %cst : f32 to vector<1x10x128xf32>
    %cst_0 = arith.constant 0.000000e+00 : f32
    %1 = vector.broadcast %cst_0 : f32 to vector<10x1x128xf32>
    %c0 = arith.constant 0 : index
    %c0_1 = arith.constant 0 : index
    %c0_2 = arith.constant 0 : index
    %2 = vector.load %arg8[%c0, %c0_1, %c0_2] : memref<10x10x128xf32, #tpu.memory_space<vmem>>, vector<1x10x128xf32>
    tpu.vector_store %arg8[%c0, %c0_1, %c0_2], %0 {strides = array<i32>} : memref<10x10x128xf32, #tpu.memory_space<vmem>>, vector<1x10x128xf32>,
    %c9 = arith.constant 9 : index
    %c0_3 = arith.constant 0 : index
    %c0_4 = arith.constant 0 : index
    %3 = vector.load %arg8[%c9, %c0_3, %c0_4] : memref<10x10x128xf32, #tpu.memory_space<vmem>>, vector<1x10x128xf32>
    tpu.vector_store %arg8[%c9, %c0_3, %c0_4], %0 {strides = array<i32>} : memref<10x10x128xf32, #tpu.memory_space<vmem>>, vector<1x10x128xf32>,
    %c0_5 = arith.constant 0 : index
    %c0_6 = arith.constant 0 : index
    %c0_7 = arith.constant 0 : index
    %4 = vector.load %arg8[%c0_5, %c0_6, %c0_7] : memref<10x10x128xf32, #tpu.memory_space<vmem>>, vector<10x1x128xf32>
    tpu.vector_store %arg8[%c0_5, %c0_6, %c0_7], %1 {strides = array<i32>} : memref<10x10x128xf32, #tpu.memory_space<vmem>>, vector<10x1x128xf32>,
    %c0_8 = arith.constant 0 : index
    %c9_9 = arith.constant 9 : index
    %c0_10 = arith.constant 0 : index
    %5 = vector.load %arg8[%c0_8, %c9_9, %c0_10] : memref<10x10x128xf32, #tpu.memory_space<vmem>>, vector<10x1x128xf32>
    tpu.vector_store %arg8[%c0_8, %c9_9, %c0_10], %1 {strides = array<i32>} : memref<10x10x128xf32, #tpu.memory_space<vmem>>, vector<10x1x128xf32>,
    %c0_11 = arith.constant 0 : index
    %c0_12 = arith.constant 0 : index
    %c0_13 = arith.constant 0 : index
    %c0_14 = arith.constant 0 : index
    %6 = vector.load %arg1[%c0_11, %c0_12, %c0_13, %c0_14] : memref<1x8x8x128xbf16, #tpu.memory_space<vmem>>, vector<1x8x8x128xbf16>
    %7 = vector.shape_cast %6 : vector<1x8x8x128xbf16> to vector<8x8x128xbf16>
    %8 = arith.extf %7 : vector<8x8x128xbf16> to vector<8x8x128xf32>
    %c0_15 = arith.constant 0 : index
    %c0_16 = arith.constant 0 : index
    %9 = vector.load %arg4[%c0_15, %c0_16] : memref<1x128xf32, #tpu.memory_space<vmem>>, vector<1x128xf32>
    %10 = vector.shape_cast %9 : vector<1x128xf32> to vector<1x1x128xf32>
    %11 = vector.broadcast %10 : vector<1x1x128xf32> to vector<8x8x128xf32>
    %12 = arith.mulf %8, %11 : vector<8x8x128xf32>
    %c0_17 = arith.constant 0 : index
    %c0_18 = arith.constant 0 : index
    %13 = vector.load %arg5[%c0_17, %c0_18] : memref<1x128xf32, #tpu.memory_space<vmem>>, vector<1x128xf32>
    %14 = vector.shape_cast %13 : vector<1x128xf32> to vector<1x1x128xf32>
    %15 = vector.broadcast %14 : vector<1x1x128xf32> to vector<8x8x128xf32>
    %16 = arith.addf %12, %15 : vector<8x8x128xf32>
    %cst_19 = arith.constant 0.000000e+00 : f32
    %17 = vector.broadcast %cst_19 : f32 to vector<8x8x128xf32>
    %18 = arith.maximumf %16, %17 : vector<8x8x128xf32>
    %c1 = arith.constant 1 : index
    %c1_20 = arith.constant 1 : index
    %c0_21 = arith.constant 0 : index
    %19 = vector.load %arg8[%c1, %c1_20, %c0_21] : memref<10x10x128xf32, #tpu.memory_space<vmem>>, vector<8x8x128xf32>
    tpu.vector_store %arg8[%c1, %c1_20, %c0_21], %18 {strides = array<i32>} : memref<10x10x128xf32, #tpu.memory_space<vmem>>, vector<8x8x128xf32>,
    %c0_22 = arith.constant 0 : index
    %c0_23 = arith.constant 0 : index
    %20 = vector.load %arg2[%c0_22, %c0_23] : memref<9x128xf32, #tpu.memory_space<vmem>>, vector<9x128xf32>
    %c0_24 = arith.constant 0 : index
    %c0_25 = arith.constant 0 : index
    %c0_26 = arith.constant 0 : index
    %21 = vector.load %arg8[%c0_24, %c0_25, %c0_26] : memref<10x10x128xf32, #tpu.memory_space<vmem>>, vector<8x8x128xf32>
    %22 = vector.extract_strided_slice %20 {offsets = [0, 0], sizes = [1, 128], strides = [1, 1]} : vector<9x128xf32> to vector<1x128xf32>
    %23 = vector.shape_cast %22 : vector<1x128xf32> to vector<128xf32>
    %24 = vector.shape_cast %23 : vector<128xf32> to vector<1x1x128xf32>
    %25 = vector.broadcast %24 : vector<1x1x128xf32> to vector<8x8x128xf32>
    %26 = arith.mulf %21, %25 : vector<8x8x128xf32>
    %c0_27 = arith.constant 0 : index
    %c1_28 = arith.constant 1 : index
    %c0_29 = arith.constant 0 : index
    %27 = vector.load %arg8[%c0_27, %c1_28, %c0_29] : memref<10x10x128xf32, #tpu.memory_space<vmem>>, vector<8x8x128xf32>
    %28 = vector.extract_strided_slice %20 {offsets = [1, 0], sizes = [1, 128], strides = [1, 1]} : vector<9x128xf32> to vector<1x128xf32>
    %29 = vector.shape_cast %28 : vector<1x128xf32> to vector<128xf32>
    %30 = vector.shape_cast %29 : vector<128xf32> to vector<1x1x128xf32>
    %31 = vector.broadcast %30 : vector<1x1x128xf32> to vector<8x8x128xf32>
    %32 = arith.mulf %27, %31 : vector<8x8x128xf32>
    %33 = arith.addf %26, %32 : vector<8x8x128xf32>
    %c0_30 = arith.constant 0 : index
    %c2 = arith.constant 2 : index
    %c0_31 = arith.constant 0 : index
    %34 = vector.load %arg8[%c0_30, %c2, %c0_31] : memref<10x10x128xf32, #tpu.memory_space<vmem>>, vector<8x8x128xf32>
    %35 = vector.extract_strided_slice %20 {offsets = [2, 0], sizes = [1, 128], strides = [1, 1]} : vector<9x128xf32> to vector<1x128xf32>
    %36 = vector.shape_cast %35 : vector<1x128xf32> to vector<128xf32>
    %37 = vector.shape_cast %36 : vector<128xf32> to vector<1x1x128xf32>
    %38 = vector.broadcast %37 : vector<1x1x128xf32> to vector<8x8x128xf32>
    %39 = arith.mulf %34, %38 : vector<8x8x128xf32>
    %40 = arith.addf %33, %39 : vector<8x8x128xf32>
    %c1_32 = arith.constant 1 : index
    %c0_33 = arith.constant 0 : index
    %c0_34 = arith.constant 0 : index
    %41 = vector.load %arg8[%c1_32, %c0_33, %c0_34] : memref<10x10x128xf32, #tpu.memory_space<vmem>>, vector<8x8x128xf32>
    %42 = vector.extract_strided_slice %20 {offsets = [3, 0], sizes = [1, 128], strides = [1, 1]} : vector<9x128xf32> to vector<1x128xf32>
    %43 = vector.shape_cast %42 : vector<1x128xf32> to vector<128xf32>
    %44 = vector.shape_cast %43 : vector<128xf32> to vector<1x1x128xf32>
    %45 = vector.broadcast %44 : vector<1x1x128xf32> to vector<8x8x128xf32>
    %46 = arith.mulf %41, %45 : vector<8x8x128xf32>
    %47 = arith.addf %40, %46 : vector<8x8x128xf32>
    %c1_35 = arith.constant 1 : index
    %c1_36 = arith.constant 1 : index
    %c0_37 = arith.constant 0 : index
    %48 = vector.load %arg8[%c1_35, %c1_36, %c0_37] : memref<10x10x128xf32, #tpu.memory_space<vmem>>, vector<8x8x128xf32>
    %49 = vector.extract_strided_slice %20 {offsets = [4, 0], sizes = [1, 128], strides = [1, 1]} : vector<9x128xf32> to vector<1x128xf32>
    %50 = vector.shape_cast %49 : vector<1x128xf32> to vector<128xf32>
    %51 = vector.shape_cast %50 : vector<128xf32> to vector<1x1x128xf32>
    %52 = vector.broadcast %51 : vector<1x1x128xf32> to vector<8x8x128xf32>
    %53 = arith.mulf %48, %52 : vector<8x8x128xf32>
    %54 = arith.addf %47, %53 : vector<8x8x128xf32>
    %c1_38 = arith.constant 1 : index
    %c2_39 = arith.constant 2 : index
    %c0_40 = arith.constant 0 : index
    %55 = vector.load %arg8[%c1_38, %c2_39, %c0_40] : memref<10x10x128xf32, #tpu.memory_space<vmem>>, vector<8x8x128xf32>
    %56 = vector.extract_strided_slice %20 {offsets = [5, 0], sizes = [1, 128], strides = [1, 1]} : vector<9x128xf32> to vector<1x128xf32>
    %57 = vector.shape_cast %56 : vector<1x128xf32> to vector<128xf32>
    %58 = vector.shape_cast %57 : vector<128xf32> to vector<1x1x128xf32>
    %59 = vector.broadcast %58 : vector<1x1x128xf32> to vector<8x8x128xf32>
    %60 = arith.mulf %55, %59 : vector<8x8x128xf32>
    %61 = arith.addf %54, %60 : vector<8x8x128xf32>
    %c2_41 = arith.constant 2 : index
    %c0_42 = arith.constant 0 : index
    %c0_43 = arith.constant 0 : index
    %62 = vector.load %arg8[%c2_41, %c0_42, %c0_43] : memref<10x10x128xf32, #tpu.memory_space<vmem>>, vector<8x8x128xf32>
    %63 = vector.extract_strided_slice %20 {offsets = [6, 0], sizes = [1, 128], strides = [1, 1]} : vector<9x128xf32> to vector<1x128xf32>
    %64 = vector.shape_cast %63 : vector<1x128xf32> to vector<128xf32>
    %65 = vector.shape_cast %64 : vector<128xf32> to vector<1x1x128xf32>
    %66 = vector.broadcast %65 : vector<1x1x128xf32> to vector<8x8x128xf32>
    %67 = arith.mulf %62, %66 : vector<8x8x128xf32>
    %68 = arith.addf %61, %67 : vector<8x8x128xf32>
    %c2_44 = arith.constant 2 : index
    %c1_45 = arith.constant 1 : index
    %c0_46 = arith.constant 0 : index
    %69 = vector.load %arg8[%c2_44, %c1_45, %c0_46] : memref<10x10x128xf32, #tpu.memory_space<vmem>>, vector<8x8x128xf32>
    %70 = vector.extract_strided_slice %20 {offsets = [7, 0], sizes = [1, 128], strides = [1, 1]} : vector<9x128xf32> to vector<1x128xf32>
    %71 = vector.shape_cast %70 : vector<1x128xf32> to vector<128xf32>
    %72 = vector.shape_cast %71 : vector<128xf32> to vector<1x1x128xf32>
    %73 = vector.broadcast %72 : vector<1x1x128xf32> to vector<8x8x128xf32>
    %74 = arith.mulf %69, %73 : vector<8x8x128xf32>
    %75 = arith.addf %68, %74 : vector<8x8x128xf32>
    %c2_47 = arith.constant 2 : index
    %c2_48 = arith.constant 2 : index
    %c0_49 = arith.constant 0 : index
    %76 = vector.load %arg8[%c2_47, %c2_48, %c0_49] : memref<10x10x128xf32, #tpu.memory_space<vmem>>, vector<8x8x128xf32>
    %77 = vector.extract_strided_slice %20 {offsets = [8, 0], sizes = [1, 128], strides = [1, 1]} : vector<9x128xf32> to vector<1x128xf32>
    %78 = vector.shape_cast %77 : vector<1x128xf32> to vector<128xf32>
    %79 = vector.shape_cast %78 : vector<128xf32> to vector<1x1x128xf32>
    %80 = vector.broadcast %79 : vector<1x1x128xf32> to vector<8x8x128xf32>
    %81 = arith.mulf %76, %80 : vector<8x8x128xf32>
    %82 = arith.addf %75, %81 : vector<8x8x128xf32>
    %83 = vector.shape_cast %82 : vector<8x8x128xf32> to vector<64x128xf32>
    %84 = arith.truncf %83 : vector<64x128xf32> to vector<64x128xbf16>
    %c0_50 = arith.constant 0 : index
    %c0_51 = arith.constant 0 : index
    %85 = vector.load %arg3[%c0_50, %c0_51] : memref<128x128xbf16, #tpu.memory_space<vmem>>, vector<128x128xbf16>
    %cst_52 = arith.constant dense<0.000000e+00> : vector<64x128xf32>
    %86 = tpu.matmul %84, %85, %cst_52 {dimension_numbers = #tpu.dot_dimension_numbers<[1], [0], [0], [1], [0, 0, 1, 1], [], []>} : vector<64x128xbf16>, vector<128x128xbf16>, vector<64x128xf32> -> vector<64x128xf32>
    %87 = vector.shape_cast %86 : vector<64x128xf32> to vector<8x8x128xf32>
    %88 = arith.truncf %87 : vector<8x8x128xf32> to vector<8x8x128xbf16>
    %c0_53 = arith.constant 0 : index
    %c0_54 = arith.constant 0 : index
    %c0_55 = arith.constant 0 : index
    %c0_56 = arith.constant 0 : index
    %89 = vector.load %arg6[%c0_53, %c0_54, %c0_55, %c0_56] : memref<1x8x8x128xbf16, #tpu.memory_space<vmem>>, vector<1x8x8x128xbf16>
    %90 = vector.shape_cast %89 : vector<1x8x8x128xbf16> to vector<8x8x128xbf16>
    %91 = vector.shape_cast %88 : vector<8x8x128xbf16> to vector<1x8x8x128xbf16>
    tpu.vector_store %arg6[%c0_53, %c0_54, %c0_55, %c0_56], %91 {strides = array<i32>} : memref<1x8x8x128xbf16, #tpu.memory_space<vmem>>, vector<1x8x8x128xbf16>,
    %cst_57 = arith.constant dense<0.000000e+00> : vector<128xf32>
    %92 = vector.multi_reduction <add>, %86, %cst_57 [0] : vector<64x128xf32> to vector<128xf32>
    %93 = vector.shape_cast %92 : vector<128xf32> to vector<1x128xf32>
    %c0_58 = arith.constant 0 : index
    %c0_59 = arith.constant 0 : index
    %c0_60 = arith.constant 0 : index
    %94 = vector.load %arg7[%c0_58, %c0_59, %c0_60] : memref<1x2x128xf32, #tpu.memory_space<vmem>>, vector<1x1x128xf32>
    %95 = vector.shape_cast %94 : vector<1x1x128xf32> to vector<1x128xf32>
    %96 = vector.shape_cast %93 : vector<1x128xf32> to vector<1x1x128xf32>
    tpu.vector_store %arg7[%c0_58, %c0_59, %c0_60], %96 {strides = array<i32>} : memref<1x2x128xf32, #tpu.memory_space<vmem>>, vector<1x1x128xf32>,
    %97 = arith.mulf %86, %86 : vector<64x128xf32>
    %cst_61 = arith.constant dense<0.000000e+00> : vector<128xf32>
    %98 = vector.multi_reduction <add>, %97, %cst_61 [0] : vector<64x128xf32> to vector<128xf32>
    %99 = vector.shape_cast %98 : vector<128xf32> to vector<1x128xf32>
    %c0_62 = arith.constant 0 : index
    %c1_63 = arith.constant 1 : index
    %c0_64 = arith.constant 0 : index
    %100 = vector.load %arg7[%c0_62, %c1_63, %c0_64] : memref<1x2x128xf32, #tpu.memory_space<vmem>>, vector<1x1x128xf32>
    %101 = vector.shape_cast %100 : vector<1x1x128xf32> to vector<1x128xf32>
    %102 = vector.shape_cast %99 : vector<1x128xf32> to vector<1x1x128xf32>
    tpu.vector_store %arg7[%c0_62, %c1_63, %c0_64], %102 {strides = array<i32>} : memref<1x2x128xf32, #tpu.memory_space<vmem>>, vector<1x1x128xf32>,
    return
  }
  func.func @transform_0(%arg0: i32) -> (i32, i32, i32, i32) {
    %c0_i32 = arith.constant 0 : i32
    %c0_i32_0 = arith.constant 0 : i32
    %c0_i32_1 = arith.constant 0 : i32
    %c0_i32_2 = arith.constant 0 : i32
    return %arg0, %c0_i32, %c0_i32_0, %c0_i32_1 : i32, i32, i32, i32
  }
  func.func @transform_1(%arg0: i32) -> (i32, i32) {
    %c0_i32 = arith.constant 0 : i32
    %c0_i32_0 = arith.constant 0 : i32
    %c0_i32_1 = arith.constant 0 : i32
    return %c0_i32, %c0_i32_0 : i32, i32
  }
  func.func @transform_2(%arg0: i32) -> (i32, i32) {
    %c0_i32 = arith.constant 0 : i32
    %c0_i32_0 = arith.constant 0 : i32
    %c0_i32_1 = arith.constant 0 : i32
    return %c0_i32, %c0_i32_0 : i32, i32
  }
  func.func @transform_3(%arg0: i32) -> (i32, i32) {
    %c0_i32 = arith.constant 0 : i32
    %c0_i32_0 = arith.constant 0 : i32
    %c0_i32_1 = arith.constant 0 : i32
    return %c0_i32, %c0_i32_0 : i32, i32
  }
  func.func @transform_4(%arg0: i32) -> (i32, i32) {
    %c0_i32 = arith.constant 0 : i32
    %c0_i32_0 = arith.constant 0 : i32
    %c0_i32_1 = arith.constant 0 : i32
    return %c0_i32, %c0_i32_0 : i32, i32
  }
  func.func @transform_5(%arg0: i32) -> (i32, i32, i32, i32) {
    %c0_i32 = arith.constant 0 : i32
    %c0_i32_0 = arith.constant 0 : i32
    %c0_i32_1 = arith.constant 0 : i32
    %c0_i32_2 = arith.constant 0 : i32
    return %arg0, %c0_i32, %c0_i32_0, %c0_i32_1 : i32, i32, i32, i32
  }
  func.func @transform_6(%arg0: i32) -> (i32, i32, i32) {
    %c0_i32 = arith.constant 0 : i32
    %c0_i32_0 = arith.constant 0 : i32
    %c0_i32_1 = arith.constant 0 : i32
    return %arg0, %c0_i32, %c0_i32_0 : i32, i32, i32
  }
}

</mosaic_0001>

<bundles_post_ra>
// kernel: sepconv_forward.2
= control target key start
LH: loop header
LB: loop body
LE: loop exit
PB: predicated region body
PF: predicated region fallthrough
CT: control target
= control target key end

     0   :  { %s1094_s24 = smov 0   ;;  %s1324_s0 = inlined_call_operand.vmem [shape: f32[2,9,9,128], index: 0, kind: input, shape index: {}]   ;;  %s1325_s1 = inlined_call_operand.vmem [shape: f32[2,9,9,128], index: 1, kind: input, shape index: {}]   ;;  %s1326_s2 = inlined_call_operand.vmem [shape: f32[2,9,9,128], index: 2, kind: input, shape index: {}]   ;;  %s1327_s3 = inlined_call_operand.vmem [shape: f32[2,9,9,128], index: 3, kind: input, shape index: {}]   ;;  %s1328_s4 = inlined_call_operand.vmem [shape: f32[9,128], index: 4, kind: input, shape index: {}]   ;;  %s1329_s5 = inlined_call_operand.vmem [shape: bf16[128,128], index: 5, kind: input, shape index: {}]   ;;  %s1330_s6 = inlined_call_operand.vmem [shape: bf16[2,8,8,128], index: 6, kind: output, shape index: {0}]   ;;  %s1331_s7 = inlined_call_operand.vmem [shape: f32[2,2,128], index: 7, kind: output, shape index: {1}]  }
   0x1 LB: > { %s906_s25 = sadd.s32 4294967295, %s1052_s24   ;;  %p910_p0 = scmp.ge.s32.totalorder %s1052_s24, 1  ;;  %s1052_s24 = sphi %s1094_s24, %s18_s24  }
   0x2   : > { %p270_p1 = scmp.lt.s32.totalorder %s1052_s24, 3 }
   0x4   : > { %p271_p2 = pnand %p910_p0, %p270_p1 }
   0x5   : > { %v1038_v0 = vld [vmem:[%s1329_s5] sm:$0xff] (!%p271_p2)   ;;  %p321_p3 = scmp.lt.s32.totalorder (!%p271_p2), %s906_s25, 1  ;;  %v361_v1 = vlaneseq (!%p271_p2)  ;;  %v1039_v2 = vld [vmem:[%s1329_s5 + $0x8] sm:$0xff] (!%p271_p2)   ;;  %v1040_v4 = vld [vmem:[%s1329_s5 + $0x10] sm:$0xff] (!%p271_p2)  }
   0x6   : > { %274 = sbr.rel (%p271_p2) target bundleno = 300 (0x12c), region = 44  ;;  %989 = vmatprep.subr.bf16.mxu0 (!%p271_p2), %v1038_v0  ;;  %1013 = vmatprep.subr.bf16.mxu1 (!%p271_p2), %v1038_v0  ;;  %v1041_v8 = vld [vmem:[%s1329_s5 + $0x18] sm:$0xff] (!%p271_p2)   ;;  %v351_v9 = vld [vmem:[%s1328_s4] sm:$0xff] (!%p271_p2)  ;;  %v1179_v34 = vld [vmem:[%s1328_s4 + $0x8] ss:$0 sm:$0xff] (!%p271_p2) }
   0x7   : > { %990 = vmatpush3.bf16.msra.mxu0 (!%p271_p2), %v1038_v0  ;;  %1021 = vmatpush3.bf16.msra.mxu1 (!%p271_p2), %v1038_v0  ;;  %v1110_v3 = vshrl.u32 (!%p271_p2), %v361_v1, 7  ;;  %v1042_v33 = vld [vmem:[%s1329_s5 + $0x20] sm:$0xff] (!%p271_p2)   ;;  %v1043_v52 = vld [vmem:[%s1329_s5 + $0x28] sm:$0xff] (!%p271_p2)  }
   0x8   : > { %991 = vmatprep.subr.bf16.mxu0 (!%p271_p2), %v1039_v2  ;;  %1014 = vmatprep.subr.bf16.mxu1 (!%p271_p2), %v1039_v2 }
   0x9   : > { %v363_v5 = vsub.s32 (!%p271_p2), 0, %v1110_v3  ;;  %v383_v6 = vsub.s32 (!%p271_p2), 1, %v1110_v3  ;;  %v411_v7 = vsub.s32 (!%p271_p2), 2, %v1110_v3  ;;  %v439_v11 = vsub.s32 (!%p271_p2), 3, %v1110_v3 }
   0xa   : > { %v467_v12 = vsub.s32 (!%p271_p2), 4, %v1110_v3  ;;  %v495_v24 = vsub.s32 (!%p271_p2), 5, %v1110_v3  ;;  %v524_v25 = vsub.s32 (!%p271_p2), 6, %v1110_v3  ;;  %v553_v32 = vsub.s32 (!%p271_p2), 7, %v1110_v3 }
   0xb   : > { %992 = vmatpush3.bf16.msra.mxu0 (!%p271_p2), %v1039_v2  ;;  %1022 = vmatpush3.bf16.msra.mxu1 (!%p271_p2), %v1039_v2  ;;  %v1149_v14 = vrot.slane (!%p271_p2), %v351_v9, %v363_v5  ;;  %v1153_v17 = vrot.slane (!%p271_p2), %v351_v9, %v383_v6  ;;  %v1155_v18 = vrot.slane (!%p271_p2), %v351_v9, %v411_v7 }
   0xc   : > { %993 = vmatprep.subr.bf16.mxu0 (!%p271_p2), %v1040_v4  ;;  %1015 = vmatprep.subr.bf16.mxu1 (!%p271_p2), %v1040_v4  ;;  %v1160_v22 = vrot.slane (!%p271_p2), %v351_v9, %v439_v11  ;;  %v1162_v23 = vrot.slane (!%p271_p2), %v351_v9, %v467_v12  ;;  %v1190_v46 = vrot.slane (!%p271_p2), %v351_v9, %v495_v24  ;;  %v1044_v11 = vld [vmem:[%s1329_s5 + $0x30] sm:$0xff] (!%p271_p2)  }
   0xd   : > { %s1333_s25 = smov (!%p321_p3, %s906_s25), 1  ;;  %v1192_v47 = vrot.slane %v351_v9, %v524_v25  ;;  %v1195_v50 = vrot.slane %v351_v9, %v553_v32 }
   0xe   : > { %s1029_s9 = smul.u32 144, %s1333_s25  ;;  %s917_s19 = sshll.u32 %s1333_s25, 1 }
   0xf   : > { %994 = vmatpush3.bf16.msra.mxu0 %v1040_v4  ;;  %1023 = vmatpush3.bf16.msra.mxu1 %v1040_v4  ;;  %s349_s22 = scalar_lea.vmem %s1331_s7, %s917_s19 }
  0x10   : > { %s1120_s12 = scalar_lea.vmem %s1324_s0, %s1029_s9  ;;  %s1125_s15 = scalar_lea.vmem %s1325_s1, %s1029_s9  ;;  %995 = vmatprep.subr.bf16.mxu0 %v1041_v8  ;;  %1016 = vmatprep.subr.bf16.mxu1 %v1041_v8 }
  0x11   : > { %s1131_s18 = scalar_lea.vmem %s1326_s2, %s1029_s9  ;;  %s1140_s23 = scalar_lea.vmem %s1327_s3, %s1029_s9  ;;  %v353_v10 = vld [vmem:[%s1120_s12] sm:$0xff]  ;;  %v354_v13 = vld [vmem:[%s1120_s12 + $0x10] sm:$0xff] }
  0x12   : > { %v373_v15 = vld [vmem:[%s1125_s15] sm:$0xff]  ;;  %v374_v16 = vld [vmem:[%s1125_s15 + $0x10] sm:$0xff]  ;;  %v365_v26 = vmul.f32 %v1149_v14, %v353_v10  ;;  %v366_v27 = vmul.f32 %v1149_v14, %v354_v13  ;;  %v526_v59 = vmul.f32 %v1192_v47, %v354_v13 }
  0x13   : > { %v401_v19 = vld [vmem:[%s1120_s12 + $0x1] sm:$0xff]  ;;  %v402_v20 = vld [vmem:[%s1120_s12 + $0x11] sm:$0xff]  ;;  %v385_v28 = vmul.f32 %v1153_v17, %v373_v15  ;;  %v386_v35 = vmul.f32 %v1153_v17, %v374_v16  ;;  %996 = vmatpush3.bf16.msra.mxu0 %v1041_v8  ;;  %1024 = vmatpush3.bf16.msra.mxu1 %v1041_v8  ;;  %v555_v61 = vmul.f32 %v1195_v50, %v374_v16 }
  0x14   : > { %v429_v21 = vld [vmem:[%s1131_s18] sm:$0xff]  ;;  %v430_v29 = vld [vmem:[%s1131_s18 + $0x10] sm:$0xff]  ;;  %v413_v36 = vmul.f32 %v1155_v18, %v401_v19  ;;  %v414_v37 = vmul.f32 %v1155_v18, %v402_v20  ;;  %v1198_v51 = vmul.f32 %v1179_v34, %v402_v20  ;;  %997 = vmatprep.subr.bf16.mxu0 %v1042_v33  ;;  %1017 = vmatprep.subr.bf16.mxu1 %v1042_v33 }
  0x15   : > { %v457_v30 = vld [vmem:[%s1140_s23] sm:$0xff]  ;;  %v458_v31 = vld [vmem:[%s1140_s23 + $0x10] sm:$0xff]  ;;  %v393_v38 = vadd.f32 %v385_v28, %v365_v26  ;;  %v441_v39 = vmul.f32 %v1160_v22, %v429_v21  ;;  %v442_v40 = vmul.f32 %v1160_v22, %v430_v29  ;;  %v394_v44 = vadd.f32 %v386_v35, %v366_v27  ;;  %v1045_v35 = vld [vmem:[%s1329_s5 + $0x38] sm:$0xff]  }
  0x16   : > { %v469_v41 = vmul.f32 %v1162_v23, %v457_v30  ;;  %v485_v42 = vld [vmem:[%s1131_s18 + $0x1] sm:$0xff]  ;;  %v486_v43 = vld [vmem:[%s1131_s18 + $0x11] sm:$0xff]  ;;  %v470_v45 = vmul.f32 %v1162_v23, %v458_v31 }
  0x17   : > { %v421_v48 = vadd.f32 %v413_v36, %v393_v38  ;;  %v919_v49 = vld [vmem:[%s1120_s12 + $0x20] sm:$0xff]  ;;  %v422_v53 = vadd.f32 %v414_v37, %v394_v44  ;;  %v497_v54 = vmul.f32 %v1190_v46, %v485_v42  ;;  %v498_v55 = vmul.f32 %v1190_v46, %v486_v43  ;;  %v356_v57 = vld [vmem:[%s1120_s12 + $0x30] sm:$0xff]  ;;  %998 = vmatpush3.bf16.msra.mxu0 %v1042_v33 }
  0x18   : > { %v927_v56 = vld [vmem:[%s1125_s15 + $0x20] sm:$0xff]  ;;  %v527_v60 = vmul.f32 %v919_v49, %v1192_v47  ;;  %v376_v63 = vld [vmem:[%s1125_s15 + $0x30] sm:$0xff]  ;;  %v367_v3 = vmul.f32 %v919_v49, %v1149_v14  ;;  %1025 = vmatpush3.bf16.msra.mxu1 %v1042_v33  ;;  %v368_v7 = vmul.f32 %v1149_v14, %v356_v57  ;;  %999 = vmatprep.subr.bf16.mxu0 %v1043_v52 }
  0x19   : > { %v449_v58 = vadd.f32 %v441_v39, %v421_v48  ;;  %v935_v62 = vld [vmem:[%s1120_s12 + $0x21] sm:$0xff]  ;;  %v450_v0 = vadd.f32 %v442_v40, %v422_v53  ;;  %v556_v1 = vmul.f32 %v927_v56, %v1195_v50  ;;  %v404_v4 = vld [vmem:[%s1120_s12 + $0x31] sm:$0xff]  ;;  %v387_v8 = vmul.f32 %v927_v56, %v1153_v17  ;;  %1018 = vmatprep.subr.bf16.mxu1 %v1043_v52 }
  0x1a   : > { %v584_v2 = vmul.f32 %v1179_v34, %v935_v62  ;;  %v431_v5 = vld [vmem:[%s1131_s18 + $0x20] sm:$0xff]  ;;  %v432_v9 = vld [vmem:[%s1131_s18 + $0x30] sm:$0xff]  ;;  %v388_v13 = vmul.f32 %v1153_v17, %v376_v63  ;;  %v415_v15 = vmul.f32 %v935_v62, %v1155_v18  ;;  %v416_v21 = vmul.f32 %v1155_v18, %v404_v4 }
  0x1b   : > { %v477_v6 = vadd.f32 %v469_v41, %v449_v58  ;;  %v459_v10 = vld [vmem:[%s1140_s23 + $0x20] sm:$0xff]  ;;  %v478_v12 = vadd.f32 %v470_v45, %v450_v0  ;;  %v460_v16 = vld [vmem:[%s1140_s23 + $0x30] sm:$0xff]  ;;  %v395_v20 = vadd.f32 %v387_v8, %v367_v3  ;;  %v443_v24 = vmul.f32 %v1160_v22, %v431_v5  ;;  %1000 = vmatpush3.bf16.msra.mxu0 %v1043_v52 }
  0x1c   : > { %v487_v25 = vld [vmem:[%s1131_s18 + $0x21] sm:$0xff]  ;;  %v396_v27 = vadd.f32 %v388_v13, %v368_v7  ;;  %v444_v28 = vmul.f32 %v1160_v22, %v432_v9  ;;  %v471_v29 = vmul.f32 %v1162_v23, %v459_v10  ;;  %v488_v30 = vld [vmem:[%s1131_s18 + $0x31] sm:$0xff]  ;;  %1026 = vmatpush3.bf16.msra.mxu1 %v1043_v52  ;;  %v472_v33 = vmul.f32 %v1162_v23, %v460_v16 }
  0x1d   : > { %v505_v19 = vadd.f32 %v497_v54, %v477_v6  ;;  %v506_v26 = vadd.f32 %v498_v55, %v478_v12  ;;  %v423_v32 = vadd.f32 %v415_v15, %v395_v20  ;;  %1001 = vmatprep.subr.bf16.mxu0 %v1044_v11  ;;  %1019 = vmatprep.subr.bf16.mxu1 %v1044_v11  ;;  %v921_v42 = vld [vmem:[%s1120_s12 + $0x40] sm:$0xff]  ;;  %v358_v53 = vld [vmem:[%s1120_s12 + $0x50] sm:$0xff] }
  0x1e   : > { %v424_v37 = vadd.f32 %v416_v21, %v396_v27  ;;  %v499_v38 = vmul.f32 %v1190_v46, %v487_v25  ;;  %v500_v41 = vmul.f32 %v1190_v46, %v488_v30  ;;  %v528_v43 = vmul.f32 %v1192_v47, %v356_v57  ;;  %v929_v49 = vld [vmem:[%s1125_s15 + $0x40] sm:$0xff]  ;;  %v378_v57 = vld [vmem:[%s1125_s15 + $0x50] sm:$0xff] }
  0x1f   : > { %v534_v31 = vadd.f32 %v526_v59, %v505_v19  ;;  %v535_v36 = vadd.f32 %v527_v60, %v506_v26  ;;  %v451_v40 = vadd.f32 %v443_v24, %v423_v32  ;;  %v529_v48 = vmul.f32 %v921_v42, %v1192_v47  ;;  %1002 = vmatpush3.bf16.msra.mxu0 %v1044_v11  ;;  %v937_v58 = vld [vmem:[%s1120_s12 + $0x41] sm:$0xff]  ;;  %v434_v6 = vld [vmem:[%s1131_s18 + $0x50] sm:$0xff] }
  0x20   : > { %v452_v45 = vadd.f32 %v444_v28, %v424_v37  ;;  %v557_v52 = vmul.f32 %v1195_v50, %v376_v63  ;;  %1027 = vmatpush3.bf16.msra.mxu1 %v1044_v11  ;;  %v558_v56 = vmul.f32 %v929_v49, %v1195_v50  ;;  %1003 = vmatprep.subr.bf16.mxu0 %v1045_v35  ;;  %v1252_v63 = vld [vmem:[%s1120_s12 + $0x51] sm:$0xff]  ;;  %v433_v5 = vld [vmem:[%s1131_s18 + $0x40] sm:$0xff] }
  0x21   : > { %v563_v39 = vadd.f32 %v555_v61, %v534_v31  ;;  %v564_v44 = vadd.f32 %v556_v1, %v535_v36  ;;  %v479_v55 = vadd.f32 %v471_v29, %v451_v40  ;;  %v585_v61 = vmul.f32 %v1179_v34, %v404_v4  ;;  %1020 = vmatprep.subr.bf16.mxu1 %v1045_v35  ;;  %v461_v9 = vld [vmem:[%s1140_s23 + $0x40] sm:$0xff]  ;;  %v462_v13 = vld [vmem:[%s1140_s23 + $0x50] sm:$0xff] }
  0x22   : > { %v480_v60 = vadd.f32 %v472_v33, %v452_v45  ;;  %v586_v62 = vmul.f32 %v1179_v34, %v937_v58  ;;  %v370_v1 = vmul.f32 %v1149_v14, %v358_v53  ;;  %v389_v3 = vmul.f32 %v929_v49, %v1153_v17  ;;  %v489_v21 = vld [vmem:[%s1131_s18 + $0x41] sm:$0xff]  ;;  %v490_v27 = vld [vmem:[%s1131_s18 + $0x51] sm:$0xff] }
  0x23   : > { %v591_v54 = vadd.f32 %v1198_v51, %v563_v39  ;;  %v592_v59 = vadd.f32 %v584_v2, %v564_v44  ;;  %v507_v0 = vadd.f32 %v499_v38, %v479_v55  ;;  %v369_v51 = vmul.f32 %v921_v42, %v1149_v14  ;;  %1004 = vmatpush3.bf16.msra.mxu0 %v1045_v35  ;;  %v923_v31 = vld [vmem:[%s1120_s12 + $0x60] sm:$0xff]  ;;  %v360_v37 = vld [vmem:[%s1120_s12 + $0x70] sm:$0xff] }
  0x24   : > { %v508_v7 = vadd.f32 %v500_v41, %v480_v60  ;;  %v390_v4 = vmul.f32 %v1153_v17, %v378_v57  ;;  %v417_v8 = vmul.f32 %v937_v58, %v1155_v18  ;;  %1028 = vmatpush3.bf16.msra.mxu1 %v1045_v35  ;;  %v418_v12 = vmul.f32 %v1155_v18, %v1252_v63  ;;  %v931_v36 = vld [vmem:[%s1125_s15 + $0x60] sm:$0xff]  ;;  %v408_v44 = vld [vmem:[%s1120_s12 + $0x71] sm:$0xff] }
  0x25   : > { %v599_v2 = vpack.c.bf16 %v592_v59, %v591_v54  ;;  %v536_v10 = vadd.f32 %v528_v43, %v507_v0  ;;  %v397_v11 = vadd.f32 %v389_v3, %v369_v51  ;;  %v445_v19 = vmul.f32 %v1160_v22, %v433_v5  ;;  %v939_v42 = vld [vmem:[%s1120_s12 + $0x61] sm:$0xff]  ;;  %v380_v43 = vld [vmem:[%s1125_s15 + $0x70] sm:$0xff] }
  0x26   : > { %v537_v15 = vadd.f32 %v529_v48, %v508_v7  ;;  %v398_v16 = vadd.f32 %v390_v4, %v370_v1  ;;  %v446_v20 = vmul.f32 %v1160_v22, %v434_v6  ;;  %v473_v26 = vmul.f32 %v1162_v23, %v461_v9  ;;  %v435_v54 = vld [vmem:[%s1131_s18 + $0x60] sm:$0xff]  ;;  %v464_v5 = vld [vmem:[%s1140_s23 + $0x70] sm:$0xff] }
  0x27   : > { %1005 = vmatprep.mubr.bf16.mxu0 %v599_v2  ;;  %v565_v24 = vadd.f32 %v557_v52, %v536_v10  ;;  %v425_v25 = vadd.f32 %v417_v8, %v397_v11  ;;  %v474_v30 = vmul.f32 %v1162_v23, %v462_v13  ;;  %v501_v35 = vmul.f32 %v1190_v46, %v489_v21  ;;  %v491_v4 = vld [vmem:[%s1131_s18 + $0x61] sm:$0xff]  ;;  %v492_v11 = vld [vmem:[%s1131_s18 + $0x71] sm:$0xff] }
  0x28   : > { %v566_v28 = vadd.f32 %v558_v56, %v537_v15  ;;  %v426_v29 = vadd.f32 %v418_v12, %v398_v16  ;;  %v502_v40 = vmul.f32 %v1190_v46, %v490_v27  ;;  %v530_v41 = vmul.f32 %v1192_v47, %v358_v53  ;;  %v436_v53 = vld [vmem:[%s1131_s18 + $0x70] sm:$0xff] }
  0x29   : > { %v593_v32 = vadd.f32 %v585_v61, %v565_v24  ;;  %v453_v33 = vadd.f32 %v445_v19, %v425_v25  ;;  %v531_v48 = vmul.f32 %v923_v31, %v1192_v47  ;;  %v559_v49 = vmul.f32 %v1195_v50, %v378_v57  ;;  %v463_v57 = vld [vmem:[%s1140_s23 + $0x60] sm:$0xff] }
  0x2a   : > { %v594_v38 = vadd.f32 %v586_v62, %v566_v28  ;;  %v454_v39 = vadd.f32 %v446_v20, %v426_v29  ;;  %v371_v52 = vmul.f32 %v923_v31, %v1149_v14  ;;  %v372_v58 = vmul.f32 %v1149_v14, %v360_v37  ;;  %v925_v20 = vld [vmem:[%s1120_s12 + $0x80] sm:$0xff] }
  0x2b   : > { %v481_v45 = vadd.f32 %v473_v26, %v453_v33  ;;  %v391_v59 = vmul.f32 %v931_v36, %v1153_v17  ;;  %v392_v61 = vmul.f32 %v1153_v17, %v380_v43  ;;  %v419_v62 = vmul.f32 %v939_v42, %v1155_v18  ;;  %v933_v28 = vld [vmem:[%s1125_s15 + $0x80] sm:$0xff]  ;;  %s953_s15 = sshll.u32 %s1333_s25, 5 }
  0x2c   : > { %v600_v55 = vpack.c.bf16 %v594_v38, %v593_v32  ;;  %v482_v56 = vadd.f32 %v474_v30, %v454_v39  ;;  %v420_v0 = vmul.f32 %v1155_v18, %v408_v44  ;;  %v560_v1 = vmul.f32 %v931_v36, %v1195_v50  ;;  %v941_v33 = vld [vmem:[%s1120_s12 + $0x81] sm:$0xff]  ;;  %s345_s18 = scalar_lea.vmem %s1330_s6, %s953_s15 }
  0x2d   : > { %v509_v60 = vadd.f32 %v501_v35, %v481_v45  ;;  %v399_v3 = vadd.f32 %v391_v59, %v371_v52  ;;  %v447_v14 = vmul.f32 %v1160_v22, %v435_v54  ;;  %v587_v2 = vmul.f32 %v1179_v34, %v1252_v63 }
  0x2e   : > { %1006 = vmatmul.mubr.bf16.vlgmr.msra.gmra.mrb[0].mxu0 %v600_v55  ;;  %v510_v51 = vadd.f32 %v502_v40, %v482_v56  ;;  %v400_v17 = vadd.f32 %v392_v61, %v372_v58  ;;  %v448_v7 = vmul.f32 %v1160_v22, %v436_v53  ;;  %v588_v8 = vmul.f32 %v1179_v34, %v939_v42 }
  0x2f   : > { %v538_v6 = vadd.f32 %v530_v41, %v509_v60  ;;  %v427_v9 = vadd.f32 %v419_v62, %v399_v3  ;;  %v475_v10 = vmul.f32 %v1162_v23, %v463_v57  ;;  %v476_v15 = vmul.f32 %v1162_v23, %v464_v5 }
  0x30   : > { %v539_v18 = vadd.f32 %v531_v48, %v510_v51  ;;  %v428_v13 = vadd.f32 %v420_v0, %v400_v17  ;;  %v503_v63 = vmul.f32 %v1190_v46, %v491_v4  ;;  %v504_v24 = vmul.f32 %v1190_v46, %v492_v11 }
  0x31   : > { %v567_v12 = vadd.f32 %v559_v49, %v538_v6  ;;  %v455_v19 = vadd.f32 %v447_v14, %v427_v9  ;;  %v532_v27 = vmul.f32 %v1192_v47, %v360_v37  ;;  %v533_v30 = vmul.f32 %v925_v20, %v1192_v47 }
  0x32   : > { %v568_v16 = vadd.f32 %v560_v1, %v539_v18  ;;  %v456_v21 = vadd.f32 %v448_v7, %v428_v13  ;;  %v561_v32 = vmul.f32 %v1195_v50, %v380_v43  ;;  %v562_v36 = vmul.f32 %v933_v28, %v1195_v50 }
  0x33   : > { %v595_v22 = vadd.f32 %v587_v2, %v567_v12  ;;  %v483_v26 = vadd.f32 %v475_v10, %v455_v19  ;;  %v589_v46 = vmul.f32 %v1179_v34, %v408_v44  ;;  %v590_v37 = vmul.f32 %v1179_v34, %v941_v33 }
  0x34   : > { %v596_v25 = vadd.f32 %v588_v8, %v568_v16  ;;  %v484_v29 = vadd.f32 %v476_v15, %v456_v21 }
  0x35   : > { %v511_v23 = vadd.f32 %v503_v63, %v483_v26 }
  0x36   : > { %v601_v31 = vpack.c.bf16 %v596_v25, %v595_v22  ;;  %v512_v35 = vadd.f32 %v504_v24, %v484_v29 }
  0x37   : > { %v540_v38 = vadd.f32 %v532_v27, %v511_v23 }
  0x38   : > { %1009 = vmatprep.mubr.bf16.mxu1 %v601_v31  ;;  %v541_v39 = vadd.f32 %v533_v30, %v512_v35 }
  0x39   : > { %v569_v40 = vadd.f32 %v561_v32, %v540_v38 }
  0x3a   : > { %v570_v41 = vadd.f32 %v562_v36, %v541_v39 }
  0x3b   : > { %v597_v42 = vadd.f32 %v589_v46, %v569_v40 }
  0x3c   : > { %v598_v47 = vadd.f32 %v590_v37, %v570_v41 }
  0x3e   : > { %v602_v45 = vpack.c.bf16 %v598_v47, %v597_v42 }
  0x40   : > { %1010 = vmatmul.mubr.bf16.vlgmr.msra.gmra.mrb[0].mxu1 %v602_v45 }
 0x101   : > { %v1007_v48 = vpop.f32.mrb[0].mxu0 }
 0x102   : > { %v701_v43 = vpop.f32.mrb[1].mxu0  ;;  %v764_v56 = vmul.f32 %v1007_v48, %v1007_v48 }
 0x103   : > { %v1008_v50 = vpop.f32.mrb[2].mxu0  ;;  %v762_v44 = vmul.f32 %v701_v43, %v701_v43 }
 0x104   : > { %v962_v49 = vpack.c.bf16 %v1008_v50, %v1007_v48  ;;  %v704_v52 = vpop.f32.mrb[3].mxu0  ;;  %v765_v53 = vmul.f32 %v1008_v50, %v1008_v50 }
 0x105   : > { %v957_v54 = vpack.c.bf16 %v704_v52, %v701_v43  ;;  %v748_v55 = vadd.f32 %v704_v52, %v701_v43  ;;  %v763_v34 = vmul.f32 %v704_v52, %v704_v52 }
 0x106   : > { %974 = vst [vmem:[%s345_s18 + $0x8] sm:$0xff] %v962_v49  }
 0x107   : > { %958 = vst [vmem:[%s345_s18] sm:$0xff] %v957_v54   ;;  %v749_v58 = vadd.f32 %v1007_v48, %v748_v55  ;;  %v770_v59 = vadd.f32 %v763_v34, %v762_v44 }
 0x109   : > { %v771_v60 = vadd.f32 %v770_v59, %v764_v56  ;;  %v750_v61 = vadd.f32 %v1008_v50, %v749_v58 }
 0x10b   : > { %v772_v62 = vadd.f32 %v771_v60, %v765_v53 }
 0x113   : > { %v1011_v0 = vpop.f32.mrb[0].mxu1 }
 0x114   : > { %v717_v57 = vpop.f32.mrb[1].mxu1  ;;  %v768_v4 = vmul.f32 %v1011_v0, %v1011_v0 }
 0x115   : > { %v751_v51 = vadd.f32 %v750_v61, %v717_v57  ;;  %v766_v1 = vmul.f32 %v717_v57, %v717_v57  ;;  %v1012_v3 = vpop.f32.mrb[2].mxu1 }
 0x116   : > { %v972_v14 = vpack.c.bf16 %v1012_v3, %v1011_v0  ;;  %v720_v5 = vpop.f32.mrb[3].mxu1  ;;  %v769_v9 = vmul.f32 %v1012_v3, %v1012_v3 }
 0x117   : > { %v773_v6 = vadd.f32 %v772_v62, %v766_v1  ;;  %v967_v2 = vpack.c.bf16 %v720_v5, %v717_v57  ;;  %v752_v17 = vadd.f32 %v751_v51, %v720_v5  ;;  %v767_v7 = vmul.f32 %v720_v5, %v720_v5 }
 0x118   : > { %976 = vst [vmem:[%s345_s18 + $0x18] sm:$0xff] %v972_v14  }
 0x119   : > { %975 = vst [vmem:[%s345_s18 + $0x10] sm:$0xff] %v967_v2   ;;  %v753_v18 = vadd.f32 %v1011_v0, %v752_v17  ;;  %v774_v8 = vadd.f32 %v773_v6, %v767_v7 }
 0x11b   : > { %v754_v10 = vadd.f32 %v1012_v3, %v753_v18  ;;  %v775_v11 = vadd.f32 %v774_v8, %v768_v4 }
 0x11d   : > { %v755_v12 = vrot.slane %v754_v10, 4  ;;  %v776_v13 = vadd.f32 %v775_v11, %v769_v9 }
 0x11f   : > { %v756_v15 = vadd.f32 %v755_v12, %v754_v10  ;;  %v777_v16 = vrot.slane %v776_v13, 4 }
 0x121   : > { %v757_v19 = vrot.slane %v756_v15, 2  ;;  %v778_v63 = vadd.f32 %v777_v16, %v776_v13 }
 0x123   : > { %v758_v20 = vadd.f32 %v757_v19, %v756_v15  ;;  %v779_v22 = vrot.slane %v778_v63, 2 }
 0x125   : > { %v759_v21 = vrot.slane %v758_v20, 1  ;;  %v780_v24 = vadd.f32 %v779_v22, %v778_v63 }
 0x127   : > { %v760_v25 = vadd.f32 %v759_v21, %v758_v20  ;;  %v781_v26 = vrot.slane %v780_v24, 1 }
 0x129   : > { %761 = vst [vmem:[%s349_s22] sm:$0x1] %v760_v25  ;;  %v782_v27 = vadd.f32 %v781_v26, %v780_v24 }
 0x12b   : > { %783 = vst [vmem:[%s349_s22 + $0x1] sm:$0x1] %v782_v27 }
 0x12c PF: > { %s18_s24 = sadd.s32 1, %s1052_s24  }
 0x12d   : > { %p15_p4 = scmp.ge.s32.totalorder %s18_s24, 4  }
 0x12f   :  { %17 = sbr.rel (!%p15_p4) target bundleno = 1 (0x1), region = 97 }

// kernel: sepconv_forward.3
= control target key start
LH: loop header
LB: loop body
LE: loop exit
PB: predicated region body
PF: predicated region fallthrough
CT: control target
= control target key end

     0   :  { %s1050_s21 = smov 0   ;;  %s1291_s0 = inlined_call_operand.vmem [shape: bf16[2,8,8,128], index: 0, kind: input, shape index: {}]   ;;  %s1292_s1 = inlined_call_operand.vmem [shape: f32[9,128], index: 1, kind: input, shape index: {}]   ;;  %s1293_s2 = inlined_call_operand.vmem [shape: bf16[128,128], index: 2, kind: input, shape index: {}]   ;;  %s1294_s3 = inlined_call_operand.vmem [shape: f32[1,128], index: 3, kind: input, shape index: {}]   ;;  %s1295_s4 = inlined_call_operand.vmem [shape: f32[1,128], index: 4, kind: input, shape index: {}]   ;;  %s1296_s5 = inlined_call_operand.vmem [shape: bf16[2,8,8,128], index: 5, kind: output, shape index: {0}]   ;;  %s1297_s6 = inlined_call_operand.vmem [shape: f32[2,2,128], index: 6, kind: output, shape index: {1}]  }
   0x1 LB: > { %s870_s22 = sadd.s32 4294967295, %s1012_s21   ;;  %p874_p0 = scmp.ge.s32.totalorder %s1012_s21, 1  ;;  %s1012_s21 = sphi %s1050_s21, %s17_s21  }
   0x2   : > { %p215_p1 = scmp.lt.s32.totalorder %s1012_s21, 3 }
   0x4   : > { %p216_p2 = pnand %p874_p0, %p215_p1 }
   0x5   : > { %v998_v0 = vld [vmem:[%s1293_s2] sm:$0xff] (!%p216_p2)   ;;  %p249_p3 = scmp.lt.s32.totalorder (!%p216_p2), %s870_s22, 1  ;;  %v362_v1 = vlaneseq (!%p216_p2)  ;;  %v999_v2 = vld [vmem:[%s1293_s2 + $0x8] sm:$0xff] (!%p216_p2)   ;;  %v1014_v3 = vmov (!%p216_p2), 0.0   ;;  %v1000_v5 = vld [vmem:[%s1293_s2 + $0x10] sm:$0xff] (!%p216_p2)  }
   0x6   : > { %219 = sbr.rel (%p216_p2) target bundleno = 316 (0x13c), region = 40  ;;  %949 = vmatprep.subr.bf16.mxu0 (!%p216_p2), %v998_v0  ;;  %973 = vmatprep.subr.bf16.mxu1 (!%p216_p2), %v998_v0  ;;  %264 = vst [vmem:[#allocation2] sm:$0xff] (!%p216_p2), %v1014_v3  ;;  %265 = vst [vmem:[#allocation2 + $0x8] sm:$0x3] (!%p216_p2), %v1014_v3  ;;  %v1001_v8 = vld [vmem:[%s1293_s2 + $0x18] sm:$0xff] (!%p216_p2)   ;;  %v352_v16 = vld [vmem:[%s1292_s1] sm:$0xff] (!%p216_p2) }
   0x7   : > { %270 = vst [vmem:[#allocation2 + $0x10] sm:$0x1] (!%p216_p2), %v1014_v3  ;;  %271 = vst [vmem:[#allocation2 + $0x20] sm:$0x1] (!%p216_p2), %v1014_v3  ;;  %950 = vmatpush3.bf16.msra.mxu0 (!%p216_p2), %v998_v0  ;;  %981 = vmatpush3.bf16.msra.mxu1 (!%p216_p2), %v998_v0  ;;  %v1066_v4 = vshrl.u32 (!%p216_p2), %v362_v1, 7  ;;  %v1002_v29 = vld [vmem:[%s1293_s2 + $0x20] sm:$0xff] (!%p216_p2)  }
   0x8   : > { %272 = vst [vmem:[#allocation2 + $0x30] sm:$0x1] (!%p216_p2), %v1014_v3  ;;  %280 = vst [vmem:[#allocation2 + $0x19] sm:$0x1] (!%p216_p2), %v1014_v3  ;;  %951 = vmatprep.subr.bf16.mxu0 (!%p216_p2), %v999_v2  ;;  %974 = vmatprep.subr.bf16.mxu1 (!%p216_p2), %v999_v2  ;;  %v1090_v12 = vld [vmem:[%s1294_s3] ss:$0 sm:$0xff] (!%p216_p2) }
   0x9   : > { %281 = vst [vmem:[#allocation2 + $0x29] sm:$0x1] (!%p216_p2), %v1014_v3  ;;  %282 = vst [vmem:[#allocation2 + $0x39] sm:$0x1] (!%p216_p2), %v1014_v3  ;;  %v364_v6 = vsub.s32 (!%p216_p2), 0, %v1066_v4  ;;  %v384_v7 = vsub.s32 (!%p216_p2), 1, %v1066_v4 }
   0xa   : > { %267 = vst [vmem:[#allocation2 + $0x90] sm:$0xff] (!%p216_p2), %v1014_v3  ;;  %268 = vst [vmem:[#allocation2 + $0x98] sm:$0x3] (!%p216_p2), %v1014_v3  ;;  %v412_v9 = vsub.s32 (!%p216_p2), 2, %v1066_v4  ;;  %v1098_v17 = vld [vmem:[%s1295_s4] ss:$0 sm:$0xff] (!%p216_p2) }
   0xb   : > { %273 = vst [vmem:[#allocation2 + $0x40] sm:$0x1] (!%p216_p2), %v1014_v3  ;;  %274 = vst [vmem:[#allocation2 + $0x50] sm:$0x1] (!%p216_p2), %v1014_v3  ;;  %952 = vmatpush3.bf16.msra.mxu0 (!%p216_p2), %v999_v2  ;;  %982 = vmatpush3.bf16.msra.mxu1 (!%p216_p2), %v999_v2  ;;  %v1100_v19 = vrot.slane (!%p216_p2), %v352_v16, %v364_v6  ;;  %v1102_v21 = vrot.slane (!%p216_p2), %v352_v16, %v384_v7  ;;  %v468_v23 = vsub.s32 (!%p216_p2), 4, %v1066_v4  ;;  %v1003_v47 = vld [vmem:[%s1293_s2 + $0x28] sm:$0xff] (!%p216_p2)  }
   0xc   : > { %275 = vst [vmem:[#allocation2 + $0x60] sm:$0x1] (!%p216_p2), %v1014_v3  ;;  %276 = vst [vmem:[#allocation2 + $0x70] sm:$0x1] (!%p216_p2), %v1014_v3  ;;  %953 = vmatprep.subr.bf16.mxu0 (!%p216_p2), %v1000_v5  ;;  %975 = vmatprep.subr.bf16.mxu1 (!%p216_p2), %v1000_v5  ;;  %v1104_v22 = vrot.slane (!%p216_p2), %v352_v16, %v412_v9  ;;  %v440_v28 = vsub.s32 (!%p216_p2), 3, %v1066_v4  ;;  %v496_v33 = vsub.s32 (!%p216_p2), 5, %v1066_v4 }
   0xd   : > { %s1299_s22 = smov (!%p249_p3, %s870_s22), 1  ;;  %277 = vst [vmem:[#allocation2 + $0x80] sm:$0x1] %v1014_v3  ;;  %283 = vst [vmem:[#allocation2 + $0x49] sm:$0x1] %v1014_v3  ;;  %v374_v20 = vld [vmem:[#allocation2 + $0x1] sm:$0xff]  ;;  %v1123_v41 = vrot.slane %v352_v16, %v468_v23 }
   0xe   : > { %284 = vst [vmem:[#allocation2 + $0x59] sm:$0x1] %v1014_v3  ;;  %285 = vst [vmem:[#allocation2 + $0x69] sm:$0x1] %v1014_v3  ;;  %s893_s29 = sshll.u32 %s1299_s22, 5  ;;  %v386_v32 = vmul.f32 %v1102_v21, %v374_v20  ;;  %v525_v38 = vsub.s32 6, %v1066_v4  ;;  %v1133_v52 = vrot.slane %v352_v16, %v440_v28  ;;  %v1135_v53 = vrot.slane %v352_v16, %v496_v33 }
   0xf   : > { %286 = vst [vmem:[#allocation2 + $0x79] sm:$0x1] %v1014_v3  ;;  %287 = vst [vmem:[#allocation2 + $0x89] sm:$0x1] %v1014_v3  ;;  %s1077_s8 = scalar_lea.vmem %s1291_s0, %s893_s29  ;;  %954 = vmatpush3.bf16.msra.mxu0 %v1000_v5  ;;  %983 = vmatpush3.bf16.msra.mxu1 %v1000_v5  ;;  %v553_v42 = vsub.s32 7, %v1066_v4  ;;  %v1004_v0 = vld [vmem:[%s1293_s2 + $0x30] sm:$0xff]  }
  0x10   : > { %269 = vst [vmem:[#allocation2] sm:$0x1] %v1014_v3  ;;  %279 = vst [vmem:[#allocation2 + $0x9] sm:$0x1] %v1014_v3  ;;  %v896_v10 = vld [vmem:[%s1077_s8] sm:$0xff]   ;;  %v931_v11 = vld [vmem:[%s1077_s8 + $0x8] sm:$0xff]   ;;  %955 = vmatprep.subr.bf16.mxu0 %v1001_v8  ;;  %976 = vmatprep.subr.bf16.mxu1 %v1001_v8  ;;  %v1137_v54 = vrot.slane %v352_v16, %v525_v38 }
  0x11   : > { %278 = vst [vmem:[#allocation2 + $0x90] sm:$0x1] %v1014_v3  ;;  %288 = vst [vmem:[#allocation2 + $0x99] sm:$0x1] %v1014_v3  ;;  %v897_v13 = vunpack.c.l.bf16 %v896_v10  ;;  %v898_v14 = vunpack.c.h.bf16 %v896_v10  ;;  %v901_v15 = vunpack.c.l.bf16 %v931_v11  ;;  %v902_v30 = vunpack.c.h.bf16 %v931_v11  ;;  %v932_v34 = vld [vmem:[%s1077_s8 + $0x10] sm:$0xff]   ;;  %v933_v51 = vld [vmem:[%s1077_s8 + $0x18] sm:$0xff]   ;;  %s258_s8 = scalar_lea.vmem %s1296_s5, %s893_s29 }
  0x12   : > { %v905_v46 = vunpack.c.l.bf16 %v932_v34  ;;  %v1129_v48 = vrot.slane %v352_v16, %v553_v42  ;;  %v906_v50 = vunpack.c.h.bf16 %v932_v34  ;;  %v909_v63 = vunpack.c.l.bf16 %v933_v51  ;;  %s879_s29 = sshll.u32 %s1299_s22, 1 }
  0x13   : > { %v312_v24 = vmul.f32 %v897_v13, %v1090_v12  ;;  %v313_v25 = vmul.f32 %v898_v14, %v1090_v12  ;;  %v314_v26 = vmul.f32 %v901_v15, %v1090_v12  ;;  %956 = vmatpush3.bf16.msra.mxu0 %v1001_v8  ;;  %984 = vmatpush3.bf16.msra.mxu1 %v1001_v8  ;;  %v910_v3 = vunpack.c.h.bf16 %v933_v51  ;;  %v1005_v14 = vld [vmem:[%s1293_s2 + $0x38] sm:$0xff]   ;;  %v1178_v15 = vld [vmem:[%s1292_s1 + $0x8] ss:$0 sm:$0xff]  ;;  %s262_s11 = scalar_lea.vmem %s1297_s6, %s879_s29 }
  0x14   : > { %957 = vmatprep.subr.bf16.mxu0 %v1002_v29  ;;  %977 = vmatprep.subr.bf16.mxu1 %v1002_v29  ;;  %v315_v49 = vmul.f32 %v902_v30, %v1090_v12  ;;  %v316_v55 = vmul.f32 %v905_v46, %v1090_v12  ;;  %v317_v4 = vmul.f32 %v906_v50, %v1090_v12 }
  0x15   : > { %v327_v35 = vadd.f32 %v1098_v17, %v312_v24  ;;  %v328_v36 = vadd.f32 %v1098_v17, %v313_v25  ;;  %v329_v37 = vadd.f32 %v1098_v17, %v314_v26  ;;  %v318_v8 = vmul.f32 %v909_v63, %v1090_v12 }
  0x16   : > { %v330_v59 = vadd.f32 %v1098_v17, %v315_v49  ;;  %v331_v62 = vadd.f32 %v1098_v17, %v316_v55  ;;  %v332_v13 = vadd.f32 %v1098_v17, %v317_v4 }
  0x17   : > { %v354_v18 = vld [vmem:[#allocation2] sm:$0xff]  ;;  %v335_v43 = vmax.f32 %v327_v35, 0.0  ;;  %v336_v44 = vmax.f32 %v328_v36, 0.0  ;;  %v337_v45 = vmax.f32 %v329_v37, 0.0  ;;  %958 = vmatpush3.bf16.msra.mxu0 %v1002_v29  ;;  %985 = vmatpush3.bf16.msra.mxu1 %v1002_v29  ;;  %v1196_v29 = vmul.f32 %v910_v3, %v1090_v12 }
  0x18   : > { %v402_v27 = vld [vmem:[#allocation2 + $0x2] sm:$0xff]  ;;  %v366_v31 = vmul.f32 %v1100_v19, %v354_v18  ;;  %959 = vmatprep.subr.bf16.mxu0 %v1003_v47  ;;  %978 = vmatprep.subr.bf16.mxu1 %v1003_v47  ;;  %v338_v2 = vmax.f32 %v330_v59, 0.0  ;;  %v339_v5 = vmax.f32 %v331_v62, 0.0  ;;  %v333_v18 = vadd.f32 %v1098_v17, %v318_v8 }
  0x19   : > { %v414_v40 = vmul.f32 %v1104_v22, %v402_v27  ;;  %344 = vst [vmem:[#allocation2 + $0x11] sm:$0xff] %v335_v43  ;;  %345 = vst [vmem:[#allocation2 + $0x21] sm:$0xff] %v336_v44  ;;  %v387_v56 = vmul.f32 %v1102_v21, %v335_v43  ;;  %v1142_v58 = vmul.f32 %v1123_v41, %v335_v43  ;;  %v1187_v26 = vmax.f32 %v332_v13, 0.0 }
  0x1a   : > { %v394_v39 = vadd.f32 %v386_v32, %v366_v31  ;;  %346 = vst [vmem:[#allocation2 + $0x31] sm:$0xff] %v337_v45  ;;  %v1146_v60 = vmul.f32 %v1123_v41, %v336_v44  ;;  %v1149_v61 = vmul.f32 %v1129_v48, %v336_v44  ;;  %v1156_v1 = vmul.f32 %v1129_v48, %v337_v45 }
  0x1b   : > { %v388_v6 = vmul.f32 %v1102_v21, %v336_v44  ;;  %v389_v7 = vmul.f32 %v1102_v21, %v337_v45  ;;  %347 = vst [vmem:[#allocation2 + $0x41] sm:$0xff] %v338_v2  ;;  %v1163_v9 = vmul.f32 %v1123_v41, %v337_v45  ;;  %v1166_v10 = vmul.f32 %v1123_v41, %v338_v2 }
  0x1c   : > { %v422_v57 = vadd.f32 %v414_v40, %v394_v39  ;;  %v1169_v11 = vmul.f32 %v1129_v48, %v338_v2  ;;  %960 = vmatpush3.bf16.msra.mxu0 %v1003_v47  ;;  %986 = vmatpush3.bf16.msra.mxu1 %v1003_v47  ;;  %348 = vst [vmem:[#allocation2 + $0x51] sm:$0xff] %v339_v5  ;;  %349 = vst [vmem:[#allocation2 + $0x61] sm:$0xff] %v1187_v26  ;;  %v1208_v44 = vmax.f32 %v333_v18, 0.0 }
  0x1d   : > { %v1181_v16 = vmul.f32 %v1129_v48, %v339_v5  ;;  %v1185_v20 = vmul.f32 %v1102_v21, %v338_v2  ;;  %961 = vmatprep.subr.bf16.mxu0 %v1004_v0  ;;  %979 = vmatprep.subr.bf16.mxu1 %v1004_v0  ;;  %v1190_v27 = vmul.f32 %v1102_v21, %v339_v5 }
  0x1e   : > { %v1193_v28 = vmul.f32 %v1123_v41, %v339_v5  ;;  %350 = vst [vmem:[#allocation2 + $0x71] sm:$0xff] %v1208_v44 }
  0x20   : > { %v355_v23 = vld [vmem:[#allocation2 + $0x10] sm:$0xff]  ;;  %v431_v25 = vld [vmem:[#allocation2 + $0x20] sm:$0xff]  ;;  %962 = vmatpush3.bf16.msra.mxu0 %v1004_v0  ;;  %987 = vmatpush3.bf16.msra.mxu1 %v1004_v0 }
  0x21   : > { %v403_v24 = vld [vmem:[#allocation2 + $0x12] sm:$0xff]  ;;  %v367_v30 = vmul.f32 %v1100_v19, %v355_v23  ;;  %v442_v32 = vmul.f32 %v1133_v52, %v355_v23  ;;  %v443_v33 = vmul.f32 %v1133_v52, %v431_v25  ;;  %v487_v34 = vld [vmem:[#allocation2 + $0x22] sm:$0xff]  ;;  %v527_v38 = vmul.f32 %v1137_v54, %v431_v25  ;;  %963 = vmatprep.subr.bf16.mxu0 %v1005_v14 }
  0x22   : > { %v415_v31 = vmul.f32 %v1104_v22, %v403_v24  ;;  %v516_v35 = vld [vmem:[#allocation2 + $0x30] sm:$0xff]  ;;  %v498_v36 = vmul.f32 %v1135_v53, %v403_v24  ;;  %v499_v37 = vmul.f32 %v1135_v53, %v487_v34  ;;  %v583_v43 = vmul.f32 %v1178_v15, %v487_v34  ;;  %980 = vmatprep.subr.bf16.mxu1 %v1005_v14  ;;  %v489_v0 = vld [vmem:[#allocation2 + $0x42] sm:$0xff] }
  0x23   : > { %v528_v39 = vmul.f32 %v1137_v54, %v516_v35  ;;  %v572_v12 = vld [vmem:[#allocation2 + $0x32] sm:$0xff]  ;;  %v395_v40 = vadd.f32 %v387_v56, %v367_v30  ;;  %v450_v42 = vadd.f32 %v442_v32, %v422_v57  ;;  %v368_v46 = vmul.f32 %v431_v25, %v1100_v19  ;;  %v433_v56 = vld [vmem:[#allocation2 + $0x40] sm:$0xff] }
  0x24   : > { %v1211_v45 = vmul.f32 %v1178_v15, %v572_v12  ;;  %v369_v47 = vmul.f32 %v516_v35, %v1100_v19  ;;  %v416_v49 = vmul.f32 %v487_v34, %v1104_v22  ;;  %v417_v55 = vmul.f32 %v572_v12, %v1104_v22  ;;  %964 = vmatpush3.bf16.msra.mxu0 %v1005_v14  ;;  %v518_v5 = vld [vmem:[#allocation2 + $0x50] sm:$0xff] }
  0x25   : > { %v423_v50 = vadd.f32 %v415_v31, %v395_v40  ;;  %v478_v51 = vadd.f32 %v1142_v58, %v450_v42  ;;  %v444_v57 = vmul.f32 %v516_v35, %v1133_v52  ;;  %v396_v59 = vadd.f32 %v388_v6, %v368_v46  ;;  %v574_v24 = vld [vmem:[#allocation2 + $0x52] sm:$0xff]  ;;  %988 = vmatpush3.bf16.msra.mxu1 %v1005_v14  ;;  %v435_v46 = vld [vmem:[#allocation2 + $0x60] sm:$0xff] }
  0x26   : > { %v397_v62 = vadd.f32 %v389_v7, %v369_v47  ;;  %v445_v63 = vmul.f32 %v1133_v52, %v433_v56  ;;  %v500_v2 = vmul.f32 %v572_v12, %v1135_v53  ;;  %v501_v58 = vmul.f32 %v1135_v53, %v489_v0 }
  0x27   : > { %v451_v3 = vadd.f32 %v443_v33, %v423_v50  ;;  %v506_v4 = vadd.f32 %v498_v36, %v478_v51  ;;  %v529_v8 = vmul.f32 %v1137_v54, %v433_v56  ;;  %v424_v13 = vadd.f32 %v416_v49, %v396_v59 }
  0x28   : > { %v425_v18 = vadd.f32 %v417_v55, %v397_v62  ;;  %v530_v23 = vmul.f32 %v1137_v54, %v518_v5  ;;  %v585_v6 = vmul.f32 %v1178_v15, %v489_v0  ;;  %v586_v30 = vmul.f32 %v1178_v15, %v574_v24 }
  0x29   : > { %v479_v7 = vadd.f32 %v1146_v60, %v451_v3  ;;  %v535_v25 = vadd.f32 %v527_v38, %v506_v4  ;;  %v370_v31 = vmul.f32 %v433_v56, %v1100_v19  ;;  %v452_v32 = vadd.f32 %v444_v57, %v424_v13  ;;  %v491_v57 = vld [vmem:[#allocation2 + $0x62] sm:$0xff] }
  0x2a   : > { %v453_v33 = vadd.f32 %v445_v63, %v425_v18  ;;  %v371_v34 = vmul.f32 %v518_v5, %v1100_v19  ;;  %v418_v35 = vmul.f32 %v489_v0, %v1104_v22  ;;  %v419_v14 = vmul.f32 %v574_v24, %v1104_v22  ;;  %v520_v63 = vld [vmem:[#allocation2 + $0x70] sm:$0xff] }
  0x2b   : > { %v507_v36 = vadd.f32 %v499_v37, %v479_v7  ;;  %v563_v12 = vadd.f32 %v1149_v61, %v535_v25  ;;  %v398_v40 = vadd.f32 %v1185_v20, %v370_v31  ;;  %v480_v60 = vadd.f32 %v1163_v9, %v452_v32  ;;  %v576_v18 = vld [vmem:[#allocation2 + $0x72] sm:$0xff] }
  0x2c   : > { %v481_v38 = vadd.f32 %v1166_v10, %v453_v33  ;;  %v399_v42 = vadd.f32 %v1190_v27, %v371_v34  ;;  %v446_v47 = vmul.f32 %v518_v5, %v1133_v52  ;;  %v447_v37 = vmul.f32 %v1133_v52, %v435_v46 }
  0x2d   : > { %v536_v49 = vadd.f32 %v528_v39, %v507_v36  ;;  %v591_v50 = vadd.f32 %v583_v43, %v563_v12  ;;  %v426_v51 = vadd.f32 %v418_v35, %v398_v40  ;;  %v508_v55 = vadd.f32 %v500_v2, %v480_v60 }
  0x2e   : > { %v509_v61 = vadd.f32 %v501_v58, %v481_v38  ;;  %v427_v56 = vadd.f32 %v419_v14, %v399_v42  ;;  %v475_v20 = vmul.f32 %v1123_v41, %v1187_v26  ;;  %v502_v27 = vmul.f32 %v574_v24, %v1135_v53 }
  0x2f   : > { %v564_v9 = vadd.f32 %v1156_v1, %v536_v49  ;;  %v454_v10 = vadd.f32 %v446_v47, %v426_v51  ;;  %v503_v59 = vmul.f32 %v1135_v53, %v491_v57  ;;  %v537_v62 = vadd.f32 %v529_v8, %v508_v55 }
  0x30   : > { %v538_v39 = vadd.f32 %v530_v23, %v509_v61  ;;  %v455_v43 = vadd.f32 %v447_v37, %v427_v56  ;;  %v531_v0 = vmul.f32 %v1137_v54, %v435_v46  ;;  %v532_v4 = vmul.f32 %v1137_v54, %v520_v63 }
  0x31   : > { %v592_v2 = vadd.f32 %v1211_v45, %v564_v9  ;;  %v482_v3 = vadd.f32 %v1193_v28, %v454_v10  ;;  %v559_v1 = vmul.f32 %v1129_v48, %v1187_v26  ;;  %v565_v58 = vadd.f32 %v1169_v11, %v537_v62 }
  0x32   : > { %v566_v5 = vadd.f32 %v1181_v16, %v538_v39  ;;  %v483_v13 = vadd.f32 %v475_v20, %v455_v43  ;;  %v560_v8 = vmul.f32 %v1129_v48, %v1208_v44  ;;  %v587_v45 = vmul.f32 %v1178_v15, %v491_v57  ;;  %v578_v43 = vld [vmem:[#allocation2 + $0x92] sm:$0xff] }
  0x33   : > { %v599_v23 = vpack.c.bf16 %v592_v2, %v591_v50  ;;  %v510_v24 = vadd.f32 %v502_v27, %v482_v3  ;;  %v588_v28 = vmul.f32 %v1178_v15, %v576_v18  ;;  %v593_v7 = vadd.f32 %v585_v6, %v565_v58 }
  0x34   : > { %v594_v25 = vadd.f32 %v586_v30, %v566_v5  ;;  %v511_v31 = vadd.f32 %v503_v59, %v483_v13  ;;  %v334_v32 = vadd.f32 %v1098_v17, %v1196_v29  ;;  %v372_v16 = vmul.f32 %v435_v46, %v1100_v19  ;;  %v550_v59 = vld [vmem:[#allocation2 + $0x91] sm:$0xff] }
  0x35   : > { %965 = vmatprep.mubr.bf16.mxu0 %v599_v23  ;;  %v539_v11 = vadd.f32 %v531_v0, %v510_v24  ;;  %v373_v33 = vmul.f32 %v520_v63, %v1100_v19  ;;  %v392_v34 = vmul.f32 %v1102_v21, %v1187_v26  ;;  %v393_v6 = vmul.f32 %v1102_v21, %v1208_v44 }
  0x36   : > { %v600_v35 = vpack.c.bf16 %v594_v25, %v593_v7  ;;  %v540_v36 = vadd.f32 %v532_v4, %v511_v31  ;;  %v342_v12 = vmax.f32 %v334_v32, 0.0  ;;  %v420_v14 = vmul.f32 %v491_v57, %v1104_v22  ;;  %v522_v57 = vld [vmem:[#allocation2 + $0x90] sm:$0xff] }
  0x37   : > { %v567_v30 = vadd.f32 %v559_v1, %v539_v11  ;;  %v400_v40 = vadd.f32 %v392_v34, %v372_v16  ;;  %v448_v29 = vmul.f32 %v520_v63, %v1133_v52  ;;  %v476_v26 = vmul.f32 %v1123_v41, %v1208_v44 }
  0x38   : > { %966 = vmatmul.mubr.bf16.vlgmr.msra.gmra.mrb[0].mxu0 %v600_v35  ;;  %v568_v17 = vadd.f32 %v560_v8, %v540_v36  ;;  %351 = vst [vmem:[#allocation2 + $0x81] sm:$0xff] %v342_v12  ;;  %v401_v42 = vadd.f32 %v393_v6, %v373_v33  ;;  %v421_v46 = vmul.f32 %v576_v18, %v1104_v22 }
  0x39   : > { %v595_v60 = vadd.f32 %v587_v45, %v567_v30  ;;  %v428_v19 = vadd.f32 %v420_v14, %v400_v40  ;;  %v504_v21 = vmul.f32 %v576_v18, %v1135_v53  ;;  %v477_v20 = vmul.f32 %v1123_v41, %v342_v12 }
  0x3a   : > { %v596_v38 = vadd.f32 %v588_v28, %v568_v17  ;;  %v429_v51 = vadd.f32 %v421_v46, %v401_v42  ;;  %v561_v27 = vmul.f32 %v1129_v48, %v342_v12  ;;  %v534_v39 = vmul.f32 %v1137_v54, %v522_v57 }
  0x3b   : > { %v456_v47 = vadd.f32 %v448_v29, %v428_v19  ;;  %v590_v3 = vmul.f32 %v1178_v15, %v578_v43 }
  0x3c   : > { %v601_v49 = vpack.c.bf16 %v596_v38, %v595_v60 }
  0x3d   : > { %v484_v50 = vadd.f32 %v476_v26, %v456_v47 }
  0x3e   : > { %969 = vmatprep.mubr.bf16.mxu1 %v601_v49 }
  0x3f   : > { %v437_v37 = vld [vmem:[#allocation2 + $0x80] sm:$0xff]  ;;  %v512_v61 = vadd.f32 %v504_v21, %v484_v50 }
  0x40   : > { %v493_v55 = vld [vmem:[#allocation2 + $0x82] sm:$0xff]  ;;  %v449_v56 = vmul.f32 %v1133_v52, %v437_v37  ;;  %v533_v44 = vmul.f32 %v1137_v54, %v437_v37  ;;  %v562_v52 = vmul.f32 %v1129_v48, %v550_v59 }
  0x41   : > { %v505_v22 = vmul.f32 %v1135_v53, %v493_v55  ;;  %v589_v41 = vmul.f32 %v1178_v15, %v493_v55 }
  0x42   : > { %v457_v9 = vadd.f32 %v449_v56, %v429_v51  ;;  %v541_v10 = vadd.f32 %v533_v44, %v512_v61 }
  0x44   : > { %v485_v62 = vadd.f32 %v477_v20, %v457_v9  ;;  %v569_v0 = vadd.f32 %v561_v27, %v541_v10 }
  0x46   : > { %v513_v63 = vadd.f32 %v505_v22, %v485_v62  ;;  %v597_v53 = vadd.f32 %v589_v41, %v569_v0 }
  0x48   : > { %v542_v2 = vadd.f32 %v534_v39, %v513_v63 }
  0x4a   : > { %v570_v4 = vadd.f32 %v562_v52, %v542_v2 }
  0x4c   : > { %v598_v1 = vadd.f32 %v590_v3, %v570_v4 }
  0x4e   : > { %v602_v58 = vpack.c.bf16 %v598_v1, %v597_v53 }
  0x50   : > { %970 = vmatmul.mubr.bf16.vlgmr.msra.gmra.mrb[0].mxu1 %v602_v58 }
 0x10b   : > { %v967_v5 = vpop.f32.mrb[0].mxu0 }
 0x10c   : > { %v701_v13 = vpop.f32.mrb[1].mxu0  ;;  %v764_v15 = vmul.f32 %v967_v5, %v967_v5 }
 0x10d   : > { %v968_v54 = vpop.f32.mrb[2].mxu0  ;;  %v762_v18 = vmul.f32 %v701_v13, %v701_v13 }
 0x10e   : > { %v919_v48 = vpack.c.bf16 %v968_v54, %v967_v5  ;;  %v704_v8 = vpop.f32.mrb[3].mxu0  ;;  %v765_v25 = vmul.f32 %v968_v54, %v968_v54 }
 0x10f   : > { %v914_v23 = vpack.c.bf16 %v704_v8, %v701_v13  ;;  %v748_v24 = vadd.f32 %v704_v8, %v701_v13  ;;  %v763_v45 = vmul.f32 %v704_v8, %v704_v8 }
 0x110   : > { %934 = vst [vmem:[%s258_s8 + $0x8] sm:$0xff] %v919_v48  }
 0x111   : > { %915 = vst [vmem:[%s258_s8] sm:$0xff] %v914_v23   ;;  %v749_v28 = vadd.f32 %v967_v5, %v748_v24  ;;  %v770_v7 = vadd.f32 %v763_v45, %v762_v18 }
 0x113   : > { %v771_v31 = vadd.f32 %v770_v7, %v764_v15  ;;  %v750_v32 = vadd.f32 %v968_v54, %v749_v28 }
 0x115   : > { %v772_v11 = vadd.f32 %v771_v31, %v765_v25 }
 0x123   : > { %v971_v16 = vpop.f32.mrb[0].mxu1 }
 0x124   : > { %v717_v33 = vpop.f32.mrb[1].mxu1  ;;  %v768_v29 = vmul.f32 %v971_v16, %v971_v16 }
 0x125   : > { %v751_v34 = vadd.f32 %v750_v32, %v717_v33  ;;  %v766_v35 = vmul.f32 %v717_v33, %v717_v33  ;;  %v972_v36 = vpop.f32.mrb[2].mxu1 }
 0x126   : > { %v929_v12 = vpack.c.bf16 %v972_v36, %v971_v16  ;;  %v720_v6 = vpop.f32.mrb[3].mxu1  ;;  %v769_v26 = vmul.f32 %v972_v36, %v972_v36 }
 0x127   : > { %v773_v30 = vadd.f32 %v772_v11, %v766_v35  ;;  %v924_v40 = vpack.c.bf16 %v720_v6, %v717_v33  ;;  %v752_v14 = vadd.f32 %v751_v34, %v720_v6  ;;  %v767_v17 = vmul.f32 %v720_v6, %v720_v6 }
 0x128   : > { %936 = vst [vmem:[%s258_s8 + $0x18] sm:$0xff] %v929_v12  }
 0x129   : > { %935 = vst [vmem:[%s258_s8 + $0x10] sm:$0xff] %v924_v40   ;;  %v753_v60 = vadd.f32 %v971_v16, %v752_v14  ;;  %v774_v19 = vadd.f32 %v773_v30, %v767_v17 }
 0x12b   : > { %v754_v38 = vadd.f32 %v972_v36, %v753_v60  ;;  %v775_v42 = vadd.f32 %v774_v19, %v768_v29 }
 0x12d   : > { %v755_v46 = vrot.slane %v754_v38, 4  ;;  %v776_v47 = vadd.f32 %v775_v42, %v769_v26 }
 0x12f   : > { %v756_v21 = vadd.f32 %v755_v46, %v754_v38  ;;  %v777_v49 = vrot.slane %v776_v47, 4 }
 0x131   : > { %v757_v50 = vrot.slane %v756_v21, 2  ;;  %v778_v51 = vadd.f32 %v777_v49, %v776_v47 }
 0x133   : > { %v758_v37 = vadd.f32 %v757_v50, %v756_v21  ;;  %v779_v55 = vrot.slane %v778_v51, 2 }
 0x135   : > { %v759_v61 = vrot.slane %v758_v37, 1  ;;  %v780_v56 = vadd.f32 %v779_v55, %v778_v51 }
 0x137   : > { %v760_v20 = vadd.f32 %v759_v61, %v758_v37  ;;  %v781_v44 = vrot.slane %v780_v56, 1 }
 0x139   : > { %761 = vst [vmem:[%s262_s11] sm:$0x1] %v760_v20  ;;  %v782_v57 = vadd.f32 %v781_v44, %v780_v56 }
 0x13b   : > { %783 = vst [vmem:[%s262_s11 + $0x1] sm:$0x1] %v782_v57 }
 0x13c PF: > { %s17_s21 = sadd.s32 1, %s1012_s21  }
 0x13d   : > { %p14_p4 = scmp.ge.s32.totalorder %s17_s21, 4  }
 0x13f   :  { %16 = sbr.rel (!%p14_p4) target bundleno = 1 (0x1), region = 85 }

</bundles_post_ra>
